<compile_context>
chip_gen: v7x
topology: tpu7x:2x2x1
jax: 0.10.0
libtpu: 0.0.40
codegen_flags: <defaults>
</compile_context>

<pallas_src>
import math
import jax
import jax.numpy as jnp
from jax.experimental import pallas as pl
from jax.experimental.pallas import tpu as pltpu


# Matmul operand dtype (accumulation is always float32 on the MXU).
MATMUL_DTYPE = jnp.bfloat16


# ----------------------------- in-kernel helpers -----------------------------

def _layer_norm(x, gamma, beta, eps=1e-5):
    # PyTorch nn.LayerNorm semantics (biased variance, eps inside sqrt).
    mu = jnp.mean(x, axis=-1, keepdims=True)
    var = jnp.mean((x - mu) ** 2, axis=-1, keepdims=True)
    return (x - mu) * jax.lax.rsqrt(var + eps) * gamma + beta


def _erf(x):
    # Abramowitz & Stegun 7.1.26 (max abs err ~1.5e-7 == float32 precision).
    # Matches torch.nn.GELU() (exact erf GELU) to float32 precision.
    a1, a2, a3, a4, a5 = 0.254829592, -0.284496736, 1.421413741, -1.453152027, 1.061405429
    p = 0.3275911
    sgn = jnp.where(x >= 0.0, 1.0, -1.0)
    ax = jnp.abs(x)
    t = 1.0 / (1.0 + p * ax)
    poly = ((((a5 * t + a4) * t + a3) * t + a2) * t + a1) * t
    return sgn * (1.0 - poly * jnp.exp(-ax * ax))


def _gelu_exact(x):
    return 0.5 * x * (1.0 + _erf(x * (1.0 / math.sqrt(2.0))))


# --------------------------------- fused kernel -------------------------------

def make_encoder_kernel(BB, N, D, H, matmul_dtype):
    """One grid step = one transformer layer applied to one batch block.

    BB: batch-block size, N: patches/image, D: embedding dim, H: heads.
    """
    S = N + 1
    Hd = D // H
    f32 = jnp.float32
    cd = matmul_dtype

    def kernel(patches_ref, pw_ref, pb_ref, cls_ref, pos_ref,
               wqkv_ref, bqkv_ref, wo_ref, bo_ref,
               ln1g_ref, ln1b_ref, w1_ref, b1_ref, w2_ref, b2_ref,
               ln2g_ref, ln2b_ref,
               lng_ref, lnb_ref, hw1_ref, hb1_ref, hw2_ref, hb2_ref,
               out_ref, seq_ref):
        layer = pl.program_id(1)
        last_layer = pl.num_programs(1) - 1

        # ---- patch embedding + [cls; tokens] + pos assembly (first layer step only)
        @pl.when(layer == 0)
        def _():
            tok = (jnp.dot(patches_ref[...].reshape(BB * N, -1), pw_ref[...],
                           preferred_element_type=f32)
                   + pb_ref[...])                                    # (BB*N, D) f32
            pos = pos_ref[...]                                       # (S, D)
            cls_row = (cls_ref[...] + pos[0:1, :]).reshape(1, 1, D)
            seq_ref[:, 0:1, :] = jnp.broadcast_to(cls_row, (BB, 1, D))
            seq_ref[:, 1:, :] = tok.reshape(BB, N, D) + pos[1:, :].reshape(1, N, D)

        # ---- one transformer encoder layer (post-norm, ReLU FFN) per grid step
        x = seq_ref[...].reshape(BB * S, D)                          # (BB*S, D) f32

        qkv = (jnp.dot(x.astype(cd), wqkv_ref[0],
                       preferred_element_type=f32)
               + bqkv_ref[0])                                        # (BB*S, 3D) f32
        # 1/sqrt(Hd) is already folded into Wq / bq host-side.
        q = qkv[:, 0 * D:1 * D].reshape(BB, S, D)
        k = qkv[:, 1 * D:2 * D].reshape(BB, S, D)
        v = qkv[:, 2 * D:3 * D].reshape(BB, S, D)

        # Stack heads along the (major) batch axis -> single batched QK^T / PV
        # and ONE softmax pass over all heads.
        qh = jnp.concatenate([q[:, :, h * Hd:(h + 1) * Hd] for h in range(H)],
                             axis=0).astype(cd)                      # (H*BB, S, Hd)
        kh = jnp.concatenate([k[:, :, h * Hd:(h + 1) * Hd] for h in range(H)],
                             axis=0).astype(cd)
        vh = jnp.concatenate([v[:, :, h * Hd:(h + 1) * Hd] for h in range(H)],
                             axis=0).astype(cd)

        s = jax.lax.dot_general(qh, kh, (((2,), (2,)), ((0,), (0,))),
                                preferred_element_type=f32)          # (H*BB, S, S)
        m = jnp.max(s, axis=-1, keepdims=True)
        e = jnp.exp(s - m)
        p = e * pl.reciprocal(jnp.sum(e, axis=-1, keepdims=True), approx=True)
        oh = jax.lax.dot_general(p.astype(cd), vh, (((2,), (1,)), ((0,), (0,))),
                                 preferred_element_type=f32)         # (H*BB, S, Hd)

        # Reassemble heads on the lane axis, then ONE full-K output projection.
        o = jnp.concatenate([oh[h * BB:(h + 1) * BB] for h in range(H)],
                            axis=-1).reshape(BB * S, D)              # (BB*S, D) f32
        attn = (jnp.dot(o.astype(cd), wo_ref[0], preferred_element_type=f32)
                + bo_ref[0])

        # TODO(synk): dropout (p=0.1) has no deterministic equivalent; eval-mode identity.
        x = _layer_norm(x + attn, ln1g_ref[0], ln1b_ref[0])

        xc = x.astype(cd)                                            # cast once, reuse
        h1 = jnp.maximum(
            jnp.dot(xc, w1_ref[0], preferred_element_type=f32) + b1_ref[0], 0.0)
        ff = (jnp.dot(h1.astype(cd), w2_ref[0], preferred_element_type=f32)
              + b2_ref[0])
        x = _layer_norm(x + ff, ln2g_ref[0], ln2b_ref[0])

        seq_ref[...] = x.reshape(BB, S, D)                           # carried to next layer

        # ---- final LayerNorm + projection head on the cls rows (last layer step only)
        @pl.when(layer == last_layer)
        def _():
            if BB == 1:
                cls_tok = x[0:1, :]                                  # (1, D)
            else:
                cls_tok = x.reshape(BB, S, D)[:, 0, :]               # (BB, D)
            y = _layer_norm(cls_tok, lng_ref[...], lnb_ref[...])
            hh = (jnp.dot(y.astype(cd), hw1_ref[...], preferred_element_type=f32)
                  + hb1_ref[...])
            hh = _gelu_exact(hh)
            out = (jnp.dot(hh.astype(cd), hw2_ref[...], preferred_element_type=f32)
                   + hb2_ref[...])                                   # (BB, enc)
            out_ref[...] = out.reshape(BB, 1, -1)

    return kernel


# ------------------------------ pallas wrapper ---------------------------------

def vit_encoder_forward(x, params, cfg, batch_block=1):
    b, c, hgt, wid = x.shape
    p = cfg["patch_size"]
    d = cfg["embedding_dim"]
    enc = cfg["encoding_dim"]
    heads = cfg["num_heads"]
    layers = cfg["num_layers"]
    ff = d * cfg["mlp_ratio"]
    nh, nw = hgt // p, wid // p
    n = nh * nw
    s_len = n + 1
    cpp = c * p * p
    assert b % batch_block == 0

    cd = MATMUL_DTYPE

    # im2col for the stride==kernel patchify conv (token order = (row, col) row-major,
    # matching x.flatten(2).transpose(1, 2)).  Cast to matmul dtype so the largest
    # input tensor is DMA'd at half the bytes.
    patches = (x.reshape(b, c, nh, p, nw, p)
                 .transpose(0, 2, 4, 1, 3, 5)
                 .reshape(b, n, cpp)).astype(cd)

    # Fold 1/sqrt(head_dim) into the Wq columns / bq (one-time weight transform).
    hd = d // heads
    scale = 1.0 / math.sqrt(hd)
    wqkv = params["wqkv"]
    wqkv = jnp.concatenate([wqkv[:, :, :d] * scale, wqkv[:, :, d:]], axis=-1)
    bqkv = params["bqkv"]
    bqkv = jnp.concatenate([bqkv[:, :, :d] * scale, bqkv[:, :, d:]], axis=-1)

    kernel = make_encoder_kernel(batch_block, n, d, heads, cd)
    grid = (b // batch_block, layers)

    def full_spec(shape):
        # Per-call tensor: whole array, same block every grid step (fetched once).
        return pl.BlockSpec(shape, lambda bb, ll, _s=len(shape): (0,) * _s)

    def per_layer(shape_tail):
        # Stacked per-layer tensor: stream one layer's slice per grid step.
        return pl.BlockSpec((1,) + shape_tail, lambda bb, ll: (ll, 0, 0))

    in_specs = [
        pl.BlockSpec((batch_block, n, cpp), lambda bb, ll: (bb, 0, 0)),  # patches
        full_spec((cpp, d)),       # patch_w
        full_spec((1, d)),         # patch_b
        full_spec((1, d)),         # cls
        full_spec((s_len, d)),     # pos
        per_layer((d, 3 * d)),     # wqkv
        per_layer((1, 3 * d)),     # bqkv
        per_layer((d, d)),         # wo
        per_layer((1, d)),         # bo
        per_layer((1, d)),         # ln1_g
        per_layer((1, d)),         # ln1_b
        per_layer((d, ff)),        # w1
        per_layer((1, ff)),        # b1
        per_layer((ff, d)),        # w2
        per_layer((1, d)),         # b2
        per_layer((1, d)),         # ln2_g
        per_layer((1, d)),         # ln2_b
        full_spec((1, d)),         # ln_g
        full_spec((1, d)),         # ln_b
        full_spec((d, d // 4)),    # head_w1
        full_spec((1, d // 4)),    # head_b1
        full_spec((d // 4, enc)),  # head_w2
        full_spec((1, enc)),       # head_b2
    ]
    out_spec = pl.BlockSpec((batch_block, 1, enc), lambda bb, ll: (bb, 0, 0))

    args = (
        patches,
        params["patch_w"].astype(cd), params["patch_b"],
        params["cls"], params["pos"],
        wqkv.astype(cd), bqkv,
        params["wo"].astype(cd), params["bo"],
        params["ln1_g"], params["ln1_b"],
        params["w1"].astype(cd), params["b1"],
        params["w2"].astype(cd), params["b2"],
        params["ln2_g"], params["ln2_b"],
        params["ln_g"], params["ln_b"],
        params["head_w1"].astype(cd), params["head_b1"],
        params["head_w2"].astype(cd), params["head_b2"],
    )

    out = pl.pallas_call(
        kernel,
        out_shape=jax.ShapeDtypeStruct((b, 1, enc), jnp.float32),
        grid_spec=pltpu.PrefetchScalarGridSpec(
            num_scalar_prefetch=0,
            grid=grid,
            in_specs=in_specs,
            out_specs=out_spec,
            scratch_shapes=[pltpu.VMEM((batch_block, s_len, d), jnp.float32)],
        ),
        compiler_params=pltpu.CompilerParams(
            dimension_semantics=("parallel", "arbitrary"),
            # Explicit VMEM budget: per-layer bf16 weights (double-buffered) +
            # activations are well under this; portable to v5e's 16 MiB scoped
            # default and v7x's 64 MiB physical VMEM.
            vmem_limit_bytes=48 * 1024 * 1024,
        ),
    )(*args)
    return out.reshape(b, enc)


# ------------------------------- params ----------------------------------------

def init_params(key, img_size, patch_size, in_channels, embedding_dim,
                encoding_dim, num_heads, num_layers, mlp_ratio):
    d = embedding_dim
    n_patches = (img_size // patch_size) ** 2
    s = n_patches + 1
    cpp = in_channels * patch_size * patch_size
    ff = d * mlp_ratio
    L = num_layers
    std = 0.02

    k_patch, k_pos, k_cls, k_qkv, k_wo, k_w1, k_w2, k_h1, k_h2 = jax.random.split(key, 9)

    def rnd(k, shape):
        return std * jax.random.normal(k, shape, jnp.float32)

    params = {
        "patch_w": rnd(k_patch, (cpp, d)),
        "patch_b": jnp.zeros((1, d), jnp.float32),
        "pos": rnd(k_pos, (s, d)),
        "cls": rnd(k_cls, (1, d)),
        # stacked per-layer transformer weights (leading axis = layer)
        "wqkv": rnd(k_qkv, (L, d, 3 * d)),
        "bqkv": jnp.zeros((L, 1, 3 * d), jnp.float32),
        "wo": rnd(k_wo, (L, d, d)),
        "bo": jnp.zeros((L, 1, d), jnp.float32),
        "ln1_g": jnp.ones((L, 1, d), jnp.float32),
        "ln1_b": jnp.zeros((L, 1, d), jnp.float32),
        "w1": rnd(k_w1, (L, d, ff)),
        "b1": jnp.zeros((L, 1, ff), jnp.float32),
        "w2": rnd(k_w2, (L, ff, d)),
        "b2": jnp.zeros((L, 1, d), jnp.float32),
        "ln2_g": jnp.ones((L, 1, d), jnp.float32),
        "ln2_b": jnp.zeros((L, 1, d), jnp.float32),
        # final LN + projection head
        "ln_g": jnp.ones((1, d), jnp.float32),
        "ln_b": jnp.zeros((1, d), jnp.float32),
        "head_w1": rnd(k_h1, (d, d // 4)),
        "head_b1": jnp.zeros((1, d // 4), jnp.float32),
        "head_w2": rnd(k_h2, (d // 4, encoding_dim)),
        "head_b2": jnp.zeros((1, encoding_dim), jnp.float32),
    }
    return params


# ----------------------------------- main --------------------------------------

if __name__ == "__main__":
    cfg = dict(img_size=16, patch_size=8, in_channels=4, embedding_dim=128,
               encoding_dim=32, num_heads=8, num_layers=2, mlp_ratio=4)

    key = jax.random.PRNGKey(0)
    pkey, xkey = jax.random.split(key)
    params = init_params(pkey, **cfg)

    x = jax.random.normal(
        xkey, (2, cfg["in_channels"], cfg["img_size"], cfg["img_size"]),
        jnp.float32)

    fwd = jax.jit(lambda xx, pp: vit_encoder_forward(xx, pp, cfg))
    out = fwd(x, params)
    jax.block_until_ready(out)
    assert out.shape == (2, cfg["encoding_dim"]) and out.dtype == jnp.float32
    print("KERNEL_OK")
</pallas_src>

<mosaic_0001>
module attributes {stable_mosaic.version = 11 : i64} {
  func.func @kernel(%arg0: i32, %arg1: i32, %arg2: memref<1x4x256xbf16, #tpu.memory_space<vmem>>, %arg3: memref<256x128xbf16, #tpu.memory_space<vmem>>, %arg4: memref<1x128xf32, #tpu.memory_space<vmem>>, %arg5: memref<1x128xf32, #tpu.memory_space<vmem>>, %arg6: memref<5x128xf32, #tpu.memory_space<vmem>>, %arg7: memref<1x128x384xbf16, #tpu.memory_space<vmem>>, %arg8: memref<1x1x384xf32, #tpu.memory_space<vmem>>, %arg9: memref<1x128x128xbf16, #tpu.memory_space<vmem>>, %arg10: memref<1x1x128xf32, #tpu.memory_space<vmem>>, %arg11: memref<1x1x128xf32, #tpu.memory_space<vmem>>, %arg12: memref<1x1x128xf32, #tpu.memory_space<vmem>>, %arg13: memref<1x128x512xbf16, #tpu.memory_space<vmem>>, %arg14: memref<1x1x512xf32, #tpu.memory_space<vmem>>, %arg15: memref<1x512x128xbf16, #tpu.memory_space<vmem>>, %arg16: memref<1x1x128xf32, #tpu.memory_space<vmem>>, %arg17: memref<1x1x128xf32, #tpu.memory_space<vmem>>, %arg18: memref<1x1x128xf32, #tpu.memory_space<vmem>>, %arg19: memref<1x128xf32, #tpu.memory_space<vmem>>, %arg20: memref<1x128xf32, #tpu.memory_space<vmem>>, %arg21: memref<128x32xbf16, #tpu.memory_space<vmem>>, %arg22: memref<1x32xf32, #tpu.memory_space<vmem>>, %arg23: memref<32x32xbf16, #tpu.memory_space<vmem>>, %arg24: memref<1x32xf32, #tpu.memory_space<vmem>>, %arg25: memref<1x1x32xf32, #tpu.memory_space<vmem>>, %arg26: memref<1x5x128xf32, #tpu.memory_space<vmem>>) attributes {dimension_semantics = [#tpu.dimension_semantics<parallel>, #tpu.dimension_semantics<arbitrary>], iteration_bounds = array<i64: 2, 2>, scalar_prefetch = 0 : i64, scratch_operands = 1 : i64, tpu.core_type = #tpu.core_type<tc>, window_params = [{transform_indices = @transform_0, window_bounds = array<i64: 1, 4, 256>}, {pipeline_mode = #tpu.pipeline_mode<synchronous>, transform_indices = @transform_1, window_bounds = array<i64: 256, 128>}, {pipeline_mode = #tpu.pipeline_mode<synchronous>, transform_indices = @transform_2, window_bounds = array<i64: 1, 128>}, {pipeline_mode = #tpu.pipeline_mode<synchronous>, transform_indices = @transform_3, window_bounds = array<i64: 1, 128>}, {pipeline_mode = #tpu.pipeline_mode<synchronous>, transform_indices = @transform_4, window_bounds = array<i64: 5, 128>}, {transform_indices = @transform_5, window_bounds = array<i64: 1, 128, 384>}, {transform_indices = @transform_6, window_bounds = array<i64: 1, 1, 384>}, {transform_indices = @transform_7, window_bounds = array<i64: 1, 128, 128>}, {transform_indices = @transform_8, window_bounds = array<i64: 1, 1, 128>}, {transform_indices = @transform_9, window_bounds = array<i64: 1, 1, 128>}, {transform_indices = @transform_10, window_bounds = array<i64: 1, 1, 128>}, {transform_indices = @transform_11, window_bounds = array<i64: 1, 128, 512>}, {transform_indices = @transform_12, window_bounds = array<i64: 1, 1, 512>}, {transform_indices = @transform_13, window_bounds = array<i64: 1, 512, 128>}, {transform_indices = @transform_14, window_bounds = array<i64: 1, 1, 128>}, {transform_indices = @transform_15, window_bounds = array<i64: 1, 1, 128>}, {transform_indices = @transform_16, window_bounds = array<i64: 1, 1, 128>}, {pipeline_mode = #tpu.pipeline_mode<synchronous>, transform_indices = @transform_17, window_bounds = array<i64: 1, 128>}, {pipeline_mode = #tpu.pipeline_mode<synchronous>, transform_indices = @transform_18, window_bounds = array<i64: 1, 128>}, {pipeline_mode = #tpu.pipeline_mode<synchronous>, transform_indices = @transform_19, window_bounds = array<i64: 128, 32>}, {pipeline_mode = #tpu.pipeline_mode<synchronous>, transform_indices = @transform_20, window_bounds = array<i64: 1, 32>}, {pipeline_mode = #tpu.pipeline_mode<synchronous>, transform_indices = @transform_21, window_bounds = array<i64: 32, 32>}, {pipeline_mode = #tpu.pipeline_mode<synchronous>, transform_indices = @transform_22, window_bounds = array<i64: 1, 32>}, {transform_indices = @transform_23, window_bounds = array<i64: 1, 1, 32>}]} {
    %c0_i32 = arith.constant 0 : i32
    %0 = arith.cmpi eq, %arg1, %c0_i32 : i32
    %1 = arith.extui %0 : i1 to i32
    %c0_i32_0 = arith.constant 0 : i32
    %2 = arith.cmpi ne, %1, %c0_i32_0 : i32
    scf.if %2 {
      %c0_61 = arith.constant 0 : index
      %c0_62 = arith.constant 0 : index
      %c0_63 = arith.constant 0 : index
      %157 = vector.load %arg2[%c0_61, %c0_62, %c0_63] : memref<1x4x256xbf16, #tpu.memory_space<vmem>>, vector<1x4x256xbf16>
      %158 = vector.shape_cast %157 : vector<1x4x256xbf16> to vector<4x256xbf16>
      %c0_64 = arith.constant 0 : index
      %c0_65 = arith.constant 0 : index
      %159 = vector.load %arg3[%c0_64, %c0_65] : memref<256x128xbf16, #tpu.memory_space<vmem>>, vector<256x128xbf16>
      %cst_66 = arith.constant dense<0.000000e+00> : vector<4x128xf32>
      %160 = tpu.matmul %158, %159, %cst_66 {dimension_numbers = #tpu.dot_dimension_numbers<[1], [0], [0], [1], [0, 0, 1, 1], [], []>} : vector<4x256xbf16>, vector<256x128xbf16>, vector<4x128xf32> -> vector<4x128xf32>
      %c0_67 = arith.constant 0 : index
      %c0_68 = arith.constant 0 : index
      %161 = vector.load %arg4[%c0_67, %c0_68] : memref<1x128xf32, #tpu.memory_space<vmem>>, vector<1x128xf32>
      %162 = vector.broadcast %161 : vector<1x128xf32> to vector<4x128xf32>
      %163 = arith.addf %160, %162 : vector<4x128xf32>
      %c0_69 = arith.constant 0 : index
      %c0_70 = arith.constant 0 : index
      %164 = vector.load %arg6[%c0_69, %c0_70] : memref<5x128xf32, #tpu.memory_space<vmem>>, vector<5x128xf32>
      %c0_71 = arith.constant 0 : index
      %c0_72 = arith.constant 0 : index
      %165 = vector.load %arg5[%c0_71, %c0_72] : memref<1x128xf32, #tpu.memory_space<vmem>>, vector<1x128xf32>
      %166 = vector.extract_strided_slice %164 {offsets = [0, 0], sizes = [1, 128], strides = [1, 1]} : vector<5x128xf32> to vector<1x128xf32>
      %167 = arith.addf %165, %166 : vector<1x128xf32>
      %168 = vector.shape_cast %167 : vector<1x128xf32> to vector<1x1x128xf32>
      %c0_73 = arith.constant 0 : index
      %c0_74 = arith.constant 0 : index
      %c0_75 = arith.constant 0 : index
      %169 = vector.load %arg26[%c0_73, %c0_74, %c0_75] : memref<1x5x128xf32, #tpu.memory_space<vmem>>, vector<1x1x128xf32>
      tpu.vector_store %arg26[%c0_73, %c0_74, %c0_75], %168 {strides = array<i32>} : memref<1x5x128xf32, #tpu.memory_space<vmem>>, vector<1x1x128xf32>,
      %170 = vector.shape_cast %163 : vector<4x128xf32> to vector<1x4x128xf32>
      %171 = vector.extract_strided_slice %164 {offsets = [1, 0], sizes = [4, 128], strides = [1, 1]} : vector<5x128xf32> to vector<4x128xf32>
      %172 = vector.shape_cast %171 : vector<4x128xf32> to vector<1x4x128xf32>
      %173 = arith.addf %170, %172 : vector<1x4x128xf32>
      %c0_76 = arith.constant 0 : index
      %c1 = arith.constant 1 : index
      %c0_77 = arith.constant 0 : index
      %174 = vector.load %arg26[%c0_76, %c1, %c0_77] : memref<1x5x128xf32, #tpu.memory_space<vmem>>, vector<1x4x128xf32>
      tpu.vector_store %arg26[%c0_76, %c1, %c0_77], %173 {strides = array<i32>} : memref<1x5x128xf32, #tpu.memory_space<vmem>>, vector<1x4x128xf32>,
    } else {
    }
    %c0 = arith.constant 0 : index
    %c0_1 = arith.constant 0 : index
    %c0_2 = arith.constant 0 : index
    %3 = vector.load %arg26[%c0, %c0_1, %c0_2] : memref<1x5x128xf32, #tpu.memory_space<vmem>>, vector<1x5x128xf32>
    %4 = vector.shape_cast %3 : vector<1x5x128xf32> to vector<5x128xf32>
    %5 = arith.truncf %4 : vector<5x128xf32> to vector<5x128xbf16>
    %c0_3 = arith.constant 0 : index
    %c0_4 = arith.constant 0 : index
    %c0_5 = arith.constant 0 : index
    %6 = vector.load %arg7[%c0_3, %c0_4, %c0_5] : memref<1x128x384xbf16, #tpu.memory_space<vmem>>, vector<1x128x384xbf16>
    %7 = vector.shape_cast %6 : vector<1x128x384xbf16> to vector<128x384xbf16>
    %cst = arith.constant dense<0.000000e+00> : vector<5x384xf32>
    %8 = tpu.matmul %5, %7, %cst {dimension_numbers = #tpu.dot_dimension_numbers<[1], [0], [0], [1], [0, 0, 1, 1], [], []>} : vector<5x128xbf16>, vector<128x384xbf16>, vector<5x384xf32> -> vector<5x384xf32>
    %c0_6 = arith.constant 0 : index
    %c0_7 = arith.constant 0 : index
    %c0_8 = arith.constant 0 : index
    %9 = vector.load %arg8[%c0_6, %c0_7, %c0_8] : memref<1x1x384xf32, #tpu.memory_space<vmem>>, vector<1x1x384xf32>
    %10 = vector.shape_cast %9 : vector<1x1x384xf32> to vector<1x384xf32>
    %11 = vector.broadcast %10 : vector<1x384xf32> to vector<5x384xf32>
    %12 = arith.addf %8, %11 : vector<5x384xf32>
    %13 = vector.extract_strided_slice %12 {offsets = [0, 0], sizes = [5, 128], strides = [1, 1]} : vector<5x384xf32> to vector<5x128xf32>
    %14 = vector.shape_cast %13 : vector<5x128xf32> to vector<1x5x128xf32>
    %15 = vector.extract_strided_slice %12 {offsets = [0, 128], sizes = [5, 128], strides = [1, 1]} : vector<5x384xf32> to vector<5x128xf32>
    %16 = vector.shape_cast %15 : vector<5x128xf32> to vector<1x5x128xf32>
    %17 = vector.extract_strided_slice %12 {offsets = [0, 256], sizes = [5, 128], strides = [1, 1]} : vector<5x384xf32> to vector<5x128xf32>
    %18 = vector.shape_cast %17 : vector<5x128xf32> to vector<1x5x128xf32>
    %19 = vector.extract_strided_slice %14 {offsets = [0, 0, 0], sizes = [1, 5, 16], strides = [1, 1, 1]} : vector<1x5x128xf32> to vector<1x5x16xf32>
    %20 = vector.extract_strided_slice %14 {offsets = [0, 0, 16], sizes = [1, 5, 16], strides = [1, 1, 1]} : vector<1x5x128xf32> to vector<1x5x16xf32>
    %21 = vector.extract_strided_slice %14 {offsets = [0, 0, 32], sizes = [1, 5, 16], strides = [1, 1, 1]} : vector<1x5x128xf32> to vector<1x5x16xf32>
    %22 = vector.extract_strided_slice %14 {offsets = [0, 0, 48], sizes = [1, 5, 16], strides = [1, 1, 1]} : vector<1x5x128xf32> to vector<1x5x16xf32>
    %23 = vector.extract_strided_slice %14 {offsets = [0, 0, 64], sizes = [1, 5, 16], strides = [1, 1, 1]} : vector<1x5x128xf32> to vector<1x5x16xf32>
    %24 = vector.extract_strided_slice %14 {offsets = [0, 0, 80], sizes = [1, 5, 16], strides = [1, 1, 1]} : vector<1x5x128xf32> to vector<1x5x16xf32>
    %25 = vector.extract_strided_slice %14 {offsets = [0, 0, 96], sizes = [1, 5, 16], strides = [1, 1, 1]} : vector<1x5x128xf32> to vector<1x5x16xf32>
    %26 = vector.extract_strided_slice %14 {offsets = [0, 0, 112], sizes = [1, 5, 16], strides = [1, 1, 1]} : vector<1x5x128xf32> to vector<1x5x16xf32>
    %27 = tpu.concatenate %19, %20, %21, %22, %23, %24, %25, %26 in 0 : vector<1x5x16xf32>, vector<1x5x16xf32>, vector<1x5x16xf32>, vector<1x5x16xf32>, vector<1x5x16xf32>, vector<1x5x16xf32>, vector<1x5x16xf32>, vector<1x5x16xf32> -> vector<8x5x16xf32>
    %28 = arith.truncf %27 : vector<8x5x16xf32> to vector<8x5x16xbf16>
    %29 = vector.extract_strided_slice %16 {offsets = [0, 0, 0], sizes = [1, 5, 16], strides = [1, 1, 1]} : vector<1x5x128xf32> to vector<1x5x16xf32>
    %30 = vector.extract_strided_slice %16 {offsets = [0, 0, 16], sizes = [1, 5, 16], strides = [1, 1, 1]} : vector<1x5x128xf32> to vector<1x5x16xf32>
    %31 = vector.extract_strided_slice %16 {offsets = [0, 0, 32], sizes = [1, 5, 16], strides = [1, 1, 1]} : vector<1x5x128xf32> to vector<1x5x16xf32>
    %32 = vector.extract_strided_slice %16 {offsets = [0, 0, 48], sizes = [1, 5, 16], strides = [1, 1, 1]} : vector<1x5x128xf32> to vector<1x5x16xf32>
    %33 = vector.extract_strided_slice %16 {offsets = [0, 0, 64], sizes = [1, 5, 16], strides = [1, 1, 1]} : vector<1x5x128xf32> to vector<1x5x16xf32>
    %34 = vector.extract_strided_slice %16 {offsets = [0, 0, 80], sizes = [1, 5, 16], strides = [1, 1, 1]} : vector<1x5x128xf32> to vector<1x5x16xf32>
    %35 = vector.extract_strided_slice %16 {offsets = [0, 0, 96], sizes = [1, 5, 16], strides = [1, 1, 1]} : vector<1x5x128xf32> to vector<1x5x16xf32>
    %36 = vector.extract_strided_slice %16 {offsets = [0, 0, 112], sizes = [1, 5, 16], strides = [1, 1, 1]} : vector<1x5x128xf32> to vector<1x5x16xf32>
    %37 = tpu.concatenate %29, %30, %31, %32, %33, %34, %35, %36 in 0 : vector<1x5x16xf32>, vector<1x5x16xf32>, vector<1x5x16xf32>, vector<1x5x16xf32>, vector<1x5x16xf32>, vector<1x5x16xf32>, vector<1x5x16xf32>, vector<1x5x16xf32> -> vector<8x5x16xf32>
    %38 = arith.truncf %37 : vector<8x5x16xf32> to vector<8x5x16xbf16>
    %39 = vector.extract_strided_slice %18 {offsets = [0, 0, 0], sizes = [1, 5, 16], strides = [1, 1, 1]} : vector<1x5x128xf32> to vector<1x5x16xf32>
    %40 = vector.extract_strided_slice %18 {offsets = [0, 0, 16], sizes = [1, 5, 16], strides = [1, 1, 1]} : vector<1x5x128xf32> to vector<1x5x16xf32>
    %41 = vector.extract_strided_slice %18 {offsets = [0, 0, 32], sizes = [1, 5, 16], strides = [1, 1, 1]} : vector<1x5x128xf32> to vector<1x5x16xf32>
    %42 = vector.extract_strided_slice %18 {offsets = [0, 0, 48], sizes = [1, 5, 16], strides = [1, 1, 1]} : vector<1x5x128xf32> to vector<1x5x16xf32>
    %43 = vector.extract_strided_slice %18 {offsets = [0, 0, 64], sizes = [1, 5, 16], strides = [1, 1, 1]} : vector<1x5x128xf32> to vector<1x5x16xf32>
    %44 = vector.extract_strided_slice %18 {offsets = [0, 0, 80], sizes = [1, 5, 16], strides = [1, 1, 1]} : vector<1x5x128xf32> to vector<1x5x16xf32>
    %45 = vector.extract_strided_slice %18 {offsets = [0, 0, 96], sizes = [1, 5, 16], strides = [1, 1, 1]} : vector<1x5x128xf32> to vector<1x5x16xf32>
    %46 = vector.extract_strided_slice %18 {offsets = [0, 0, 112], sizes = [1, 5, 16], strides = [1, 1, 1]} : vector<1x5x128xf32> to vector<1x5x16xf32>
    %47 = tpu.concatenate %39, %40, %41, %42, %43, %44, %45, %46 in 0 : vector<1x5x16xf32>, vector<1x5x16xf32>, vector<1x5x16xf32>, vector<1x5x16xf32>, vector<1x5x16xf32>, vector<1x5x16xf32>, vector<1x5x16xf32>, vector<1x5x16xf32> -> vector<8x5x16xf32>
    %48 = arith.truncf %47 : vector<8x5x16xf32> to vector<8x5x16xbf16>
    %cst_9 = arith.constant dense<0.000000e+00> : vector<8x5x5xf32>
    %49 = tpu.matmul %28, %38, %cst_9 {dimension_numbers = #tpu.dot_dimension_numbers<[2], [2], [1], [1], [0, 0, 0, 1, 1, 1], [0], [0]>} : vector<8x5x16xbf16>, vector<8x5x16xbf16>, vector<8x5x5xf32> -> vector<8x5x5xf32>
    %cst_10 = arith.constant dense<0xFF800000> : vector<8x5xf32>
    %50 = vector.multi_reduction <maximumf>, %49, %cst_10 [2] : vector<8x5x5xf32> to vector<8x5xf32>
    %51 = vector.shape_cast %50 : vector<8x5xf32> to vector<8x5x1xf32>
    %52 = vector.broadcast %51 : vector<8x5x1xf32> to vector<8x5x5xf32>
    %53 = arith.subf %49, %52 : vector<8x5x5xf32>
    %54 = math.exp %53 : vector<8x5x5xf32>
    %cst_11 = arith.constant dense<0.000000e+00> : vector<8x5xf32>
    %55 = vector.multi_reduction <add>, %54, %cst_11 [2] : vector<8x5x5xf32> to vector<8x5xf32>
    %56 = vector.shape_cast %55 : vector<8x5xf32> to vector<8x5x1xf32>
    %57 = tpu.reciprocal %56 {approx = true} : vector<8x5x1xf32> -> vector<8x5x1xf32>
    %58 = vector.broadcast %57 : vector<8x5x1xf32> to vector<8x5x5xf32>
    %59 = arith.mulf %54, %58 : vector<8x5x5xf32>
    %60 = arith.truncf %59 : vector<8x5x5xf32> to vector<8x5x5xbf16>
    %cst_12 = arith.constant dense<0.000000e+00> : vector<8x5x16xf32>
    %61 = tpu.matmul %60, %48, %cst_12 {dimension_numbers = #tpu.dot_dimension_numbers<[2], [1], [1], [2], [0, 0, 0, 1, 1, 2], [0], [0]>} : vector<8x5x5xbf16>, vector<8x5x16xbf16>, vector<8x5x16xf32> -> vector<8x5x16xf32>
    %62 = vector.extract_strided_slice %61 {offsets = [0, 0, 0], sizes = [1, 5, 16], strides = [1, 1, 1]} : vector<8x5x16xf32> to vector<1x5x16xf32>
    %63 = vector.extract_strided_slice %61 {offsets = [1, 0, 0], sizes = [1, 5, 16], strides = [1, 1, 1]} : vector<8x5x16xf32> to vector<1x5x16xf32>
    %64 = vector.extract_strided_slice %61 {offsets = [2, 0, 0], sizes = [1, 5, 16], strides = [1, 1, 1]} : vector<8x5x16xf32> to vector<1x5x16xf32>
    %65 = vector.extract_strided_slice %61 {offsets = [3, 0, 0], sizes = [1, 5, 16], strides = [1, 1, 1]} : vector<8x5x16xf32> to vector<1x5x16xf32>
    %66 = vector.extract_strided_slice %61 {offsets = [4, 0, 0], sizes = [1, 5, 16], strides = [1, 1, 1]} : vector<8x5x16xf32> to vector<1x5x16xf32>
    %67 = vector.extract_strided_slice %61 {offsets = [5, 0, 0], sizes = [1, 5, 16], strides = [1, 1, 1]} : vector<8x5x16xf32> to vector<1x5x16xf32>
    %68 = vector.extract_strided_slice %61 {offsets = [6, 0, 0], sizes = [1, 5, 16], strides = [1, 1, 1]} : vector<8x5x16xf32> to vector<1x5x16xf32>
    %69 = vector.extract_strided_slice %61 {offsets = [7, 0, 0], sizes = [1, 5, 16], strides = [1, 1, 1]} : vector<8x5x16xf32> to vector<1x5x16xf32>
    %70 = tpu.concatenate %62, %63, %64, %65, %66, %67, %68, %69 in 2 : vector<1x5x16xf32>, vector<1x5x16xf32>, vector<1x5x16xf32>, vector<1x5x16xf32>, vector<1x5x16xf32>, vector<1x5x16xf32>, vector<1x5x16xf32>, vector<1x5x16xf32> -> vector<1x5x128xf32>
    %71 = vector.shape_cast %70 : vector<1x5x128xf32> to vector<5x128xf32>
    %72 = arith.truncf %71 : vector<5x128xf32> to vector<5x128xbf16>
    %c0_13 = arith.constant 0 : index
    %c0_14 = arith.constant 0 : index
    %c0_15 = arith.constant 0 : index
    %73 = vector.load %arg9[%c0_13, %c0_14, %c0_15] : memref<1x128x128xbf16, #tpu.memory_space<vmem>>, vector<1x128x128xbf16>
    %74 = vector.shape_cast %73 : vector<1x128x128xbf16> to vector<128x128xbf16>
    %cst_16 = arith.constant dense<0.000000e+00> : vector<5x128xf32>
    %75 = tpu.matmul %72, %74, %cst_16 {dimension_numbers = #tpu.dot_dimension_numbers<[1], [0], [0], [1], [0, 0, 1, 1], [], []>} : vector<5x128xbf16>, vector<128x128xbf16>, vector<5x128xf32> -> vector<5x128xf32>
    %c0_17 = arith.constant 0 : index
    %c0_18 = arith.constant 0 : index
    %c0_19 = arith.constant 0 : index
    %76 = vector.load %arg10[%c0_17, %c0_18, %c0_19] : memref<1x1x128xf32, #tpu.memory_space<vmem>>, vector<1x1x128xf32>
    %77 = vector.shape_cast %76 : vector<1x1x128xf32> to vector<1x128xf32>
    %78 = vector.broadcast %77 : vector<1x128xf32> to vector<5x128xf32>
    %79 = arith.addf %75, %78 : vector<5x128xf32>
    %80 = arith.addf %4, %79 : vector<5x128xf32>
    %c0_20 = arith.constant 0 : index
    %c0_21 = arith.constant 0 : index
    %c0_22 = arith.constant 0 : index
    %81 = vector.load %arg11[%c0_20, %c0_21, %c0_22] : memref<1x1x128xf32, #tpu.memory_space<vmem>>, vector<1x1x128xf32>
    %82 = vector.shape_cast %81 : vector<1x1x128xf32> to vector<1x128xf32>
    %c0_23 = arith.constant 0 : index
    %c0_24 = arith.constant 0 : index
    %c0_25 = arith.constant 0 : index
    %83 = vector.load %arg12[%c0_23, %c0_24, %c0_25] : memref<1x1x128xf32, #tpu.memory_space<vmem>>, vector<1x1x128xf32>
    %84 = vector.shape_cast %83 : vector<1x1x128xf32> to vector<1x128xf32>
    %cst_26 = arith.constant dense<0.000000e+00> : vector<5xf32>
    %85 = vector.multi_reduction <add>, %80, %cst_26 [1] : vector<5x128xf32> to vector<5xf32>
    %86 = vector.shape_cast %85 : vector<5xf32> to vector<5x1xf32>
    %cst_27 = arith.constant 1.280000e+02 : f32
    %87 = vector.broadcast %cst_27 : f32 to vector<5x1xf32>
    %88 = arith.divf %86, %87 : vector<5x1xf32>
    %89 = vector.broadcast %88 : vector<5x1xf32> to vector<5x128xf32>
    %90 = arith.subf %80, %89 : vector<5x128xf32>
    %91 = arith.mulf %90, %90 : vector<5x128xf32>
    %cst_28 = arith.constant dense<0.000000e+00> : vector<5xf32>
    %92 = vector.multi_reduction <add>, %91, %cst_28 [1] : vector<5x128xf32> to vector<5xf32>
    %93 = vector.shape_cast %92 : vector<5xf32> to vector<5x1xf32>
    %cst_29 = arith.constant 1.280000e+02 : f32
    %94 = vector.broadcast %cst_29 : f32 to vector<5x1xf32>
    %95 = arith.divf %93, %94 : vector<5x1xf32>
    %96 = vector.broadcast %88 : vector<5x1xf32> to vector<5x128xf32>
    %97 = arith.subf %80, %96 : vector<5x128xf32>
    %cst_30 = arith.constant 9.99999974E-6 : f32
    %98 = vector.broadcast %cst_30 : f32 to vector<5x1xf32>
    %99 = arith.addf %95, %98 : vector<5x1xf32>
    %100 = math.rsqrt %99 : vector<5x1xf32>
    %101 = vector.broadcast %100 : vector<5x1xf32> to vector<5x128xf32>
    %102 = arith.mulf %97, %101 : vector<5x128xf32>
    %103 = vector.broadcast %82 : vector<1x128xf32> to vector<5x128xf32>
    %104 = arith.mulf %102, %103 : vector<5x128xf32>
    %105 = vector.broadcast %84 : vector<1x128xf32> to vector<5x128xf32>
    %106 = arith.addf %104, %105 : vector<5x128xf32>
    %107 = arith.truncf %106 : vector<5x128xf32> to vector<5x128xbf16>
    %c0_31 = arith.constant 0 : index
    %c0_32 = arith.constant 0 : index
    %c0_33 = arith.constant 0 : index
    %108 = vector.load %arg13[%c0_31, %c0_32, %c0_33] : memref<1x128x512xbf16, #tpu.memory_space<vmem>>, vector<1x128x512xbf16>
    %109 = vector.shape_cast %108 : vector<1x128x512xbf16> to vector<128x512xbf16>
    %cst_34 = arith.constant dense<0.000000e+00> : vector<5x512xf32>
    %110 = tpu.matmul %107, %109, %cst_34 {dimension_numbers = #tpu.dot_dimension_numbers<[1], [0], [0], [1], [0, 0, 1, 1], [], []>} : vector<5x128xbf16>, vector<128x512xbf16>, vector<5x512xf32> -> vector<5x512xf32>
    %c0_35 = arith.constant 0 : index
    %c0_36 = arith.constant 0 : index
    %c0_37 = arith.constant 0 : index
    %111 = vector.load %arg14[%c0_35, %c0_36, %c0_37] : memref<1x1x512xf32, #tpu.memory_space<vmem>>, vector<1x1x512xf32>
    %112 = vector.shape_cast %111 : vector<1x1x512xf32> to vector<1x512xf32>
    %113 = vector.broadcast %112 : vector<1x512xf32> to vector<5x512xf32>
    %114 = arith.addf %110, %113 : vector<5x512xf32>
    %cst_38 = arith.constant 0.000000e+00 : f32
    %115 = vector.broadcast %cst_38 : f32 to vector<5x512xf32>
    %116 = arith.maximumf %114, %115 : vector<5x512xf32>
    %117 = arith.truncf %116 : vector<5x512xf32> to vector<5x512xbf16>
    %c0_39 = arith.constant 0 : index
    %c0_40 = arith.constant 0 : index
    %c0_41 = arith.constant 0 : index
    %118 = vector.load %arg15[%c0_39, %c0_40, %c0_41] : memref<1x512x128xbf16, #tpu.memory_space<vmem>>, vector<1x512x128xbf16>
    %119 = vector.shape_cast %118 : vector<1x512x128xbf16> to vector<512x128xbf16>
    %cst_42 = arith.constant dense<0.000000e+00> : vector<5x128xf32>
    %120 = tpu.matmul %117, %119, %cst_42 {dimension_numbers = #tpu.dot_dimension_numbers<[1], [0], [0], [1], [0, 0, 1, 1], [], []>} : vector<5x512xbf16>, vector<512x128xbf16>, vector<5x128xf32> -> vector<5x128xf32>
    %c0_43 = arith.constant 0 : index
    %c0_44 = arith.constant 0 : index
    %c0_45 = arith.constant 0 : index
    %121 = vector.load %arg16[%c0_43, %c0_44, %c0_45] : memref<1x1x128xf32, #tpu.memory_space<vmem>>, vector<1x1x128xf32>
    %122 = vector.shape_cast %121 : vector<1x1x128xf32> to vector<1x128xf32>
    %123 = vector.broadcast %122 : vector<1x128xf32> to vector<5x128xf32>
    %124 = arith.addf %120, %123 : vector<5x128xf32>
    %125 = arith.addf %106, %124 : vector<5x128xf32>
    %c0_46 = arith.constant 0 : index
    %c0_47 = arith.constant 0 : index
    %c0_48 = arith.constant 0 : index
    %126 = vector.load %arg17[%c0_46, %c0_47, %c0_48] : memref<1x1x128xf32, #tpu.memory_space<vmem>>, vector<1x1x128xf32>
    %127 = vector.shape_cast %126 : vector<1x1x128xf32> to vector<1x128xf32>
    %c0_49 = arith.constant 0 : index
    %c0_50 = arith.constant 0 : index
    %c0_51 = arith.constant 0 : index
    %128 = vector.load %arg18[%c0_49, %c0_50, %c0_51] : memref<1x1x128xf32, #tpu.memory_space<vmem>>, vector<1x1x128xf32>
    %129 = vector.shape_cast %128 : vector<1x1x128xf32> to vector<1x128xf32>
    %cst_52 = arith.constant dense<0.000000e+00> : vector<5xf32>
    %130 = vector.multi_reduction <add>, %125, %cst_52 [1] : vector<5x128xf32> to vector<5xf32>
    %131 = vector.shape_cast %130 : vector<5xf32> to vector<5x1xf32>
    %cst_53 = arith.constant 1.280000e+02 : f32
    %132 = vector.broadcast %cst_53 : f32 to vector<5x1xf32>
    %133 = arith.divf %131, %132 : vector<5x1xf32>
    %134 = vector.broadcast %133 : vector<5x1xf32> to vector<5x128xf32>
    %135 = arith.subf %125, %134 : vector<5x128xf32>
    %136 = arith.mulf %135, %135 : vector<5x128xf32>
    %cst_54 = arith.constant dense<0.000000e+00> : vector<5xf32>
    %137 = vector.multi_reduction <add>, %136, %cst_54 [1] : vector<5x128xf32> to vector<5xf32>
    %138 = vector.shape_cast %137 : vector<5xf32> to vector<5x1xf32>
    %cst_55 = arith.constant 1.280000e+02 : f32
    %139 = vector.broadcast %cst_55 : f32 to vector<5x1xf32>
    %140 = arith.divf %138, %139 : vector<5x1xf32>
    %141 = vector.broadcast %133 : vector<5x1xf32> to vector<5x128xf32>
    %142 = arith.subf %125, %141 : vector<5x128xf32>
    %cst_56 = arith.constant 9.99999974E-6 : f32
    %143 = vector.broadcast %cst_56 : f32 to vector<5x1xf32>
    %144 = arith.addf %140, %143 : vector<5x1xf32>
    %145 = math.rsqrt %144 : vector<5x1xf32>
    %146 = vector.broadcast %145 : vector<5x1xf32> to vector<5x128xf32>
    %147 = arith.mulf %142, %146 : vector<5x128xf32>
    %148 = vector.broadcast %127 : vector<1x128xf32> to vector<5x128xf32>
    %149 = arith.mulf %147, %148 : vector<5x128xf32>
    %150 = vector.broadcast %129 : vector<1x128xf32> to vector<5x128xf32>
    %151 = arith.addf %149, %150 : vector<5x128xf32>
    %152 = vector.shape_cast %151 : vector<5x128xf32> to vector<1x5x128xf32>
    %c0_57 = arith.constant 0 : index
    %c0_58 = arith.constant 0 : index
    %c0_59 = arith.constant 0 : index
    %153 = vector.load %arg26[%c0_57, %c0_58, %c0_59] : memref<1x5x128xf32, #tpu.memory_space<vmem>>, vector<1x5x128xf32>
    tpu.vector_store %arg26[%c0_57, %c0_58, %c0_59], %152 {strides = array<i32>} : memref<1x5x128xf32, #tpu.memory_space<vmem>>, vector<1x5x128xf32>,
    %c1_i32 = arith.constant 1 : i32
    %154 = arith.cmpi eq, %arg1, %c1_i32 : i32
    %155 = arith.extui %154 : i1 to i32
    %c0_i32_60 = arith.constant 0 : i32
    %156 = arith.cmpi ne, %155, %c0_i32_60 : i32
    scf.if %156 {
      %157 = vector.extract_strided_slice %151 {offsets = [0, 0], sizes = [1, 128], strides = [1, 1]} : vector<5x128xf32> to vector<1x128xf32>
      %c0_61 = arith.constant 0 : index
      %c0_62 = arith.constant 0 : index
      %158 = vector.load %arg19[%c0_61, %c0_62] : memref<1x128xf32, #tpu.memory_space<vmem>>, vector<1x128xf32>
      %c0_63 = arith.constant 0 : index
      %c0_64 = arith.constant 0 : index
      %159 = vector.load %arg20[%c0_63, %c0_64] : memref<1x128xf32, #tpu.memory_space<vmem>>, vector<1x128xf32>
      %cst_65 = arith.constant dense<0.000000e+00> : vector<1xf32>
      %160 = vector.multi_reduction <add>, %157, %cst_65 [1] : vector<1x128xf32> to vector<1xf32>
      %161 = vector.shape_cast %160 : vector<1xf32> to vector<1x1xf32>
      %cst_66 = arith.constant 1.280000e+02 : f32
      %162 = vector.broadcast %cst_66 : f32 to vector<1x1xf32>
      %163 = arith.divf %161, %162 : vector<1x1xf32>
      %164 = vector.broadcast %163 : vector<1x1xf32> to vector<1x128xf32>
      %165 = arith.subf %157, %164 : vector<1x128xf32>
      %166 = arith.mulf %165, %165 : vector<1x128xf32>
      %cst_67 = arith.constant dense<0.000000e+00> : vector<1xf32>
      %167 = vector.multi_reduction <add>, %166, %cst_67 [1] : vector<1x128xf32> to vector<1xf32>
      %168 = vector.shape_cast %167 : vector<1xf32> to vector<1x1xf32>
      %cst_68 = arith.constant 1.280000e+02 : f32
      %169 = vector.broadcast %cst_68 : f32 to vector<1x1xf32>
      %170 = arith.divf %168, %169 : vector<1x1xf32>
      %171 = vector.broadcast %163 : vector<1x1xf32> to vector<1x128xf32>
      %172 = arith.subf %157, %171 : vector<1x128xf32>
      %cst_69 = arith.constant 9.99999974E-6 : f32
      %173 = vector.broadcast %cst_69 : f32 to vector<1x1xf32>
      %174 = arith.addf %170, %173 : vector<1x1xf32>
      %175 = math.rsqrt %174 : vector<1x1xf32>
      %176 = vector.broadcast %175 : vector<1x1xf32> to vector<1x128xf32>
      %177 = arith.mulf %172, %176 : vector<1x128xf32>
      %178 = arith.mulf %177, %158 : vector<1x128xf32>
      %179 = arith.addf %178, %159 : vector<1x128xf32>
      %180 = arith.truncf %179 : vector<1x128xf32> to vector<1x128xbf16>
      %c0_70 = arith.constant 0 : index
      %c0_71 = arith.constant 0 : index
      %181 = vector.load %arg21[%c0_70, %c0_71] : memref<128x32xbf16, #tpu.memory_space<vmem>>, vector<128x32xbf16>
      %cst_72 = arith.constant dense<0.000000e+00> : vector<1x32xf32>
      %182 = tpu.matmul %180, %181, %cst_72 {dimension_numbers = #tpu.dot_dimension_numbers<[1], [0], [0], [1], [0, 0, 1, 1], [], []>} : vector<1x128xbf16>, vector<128x32xbf16>, vector<1x32xf32> -> vector<1x32xf32>
      %c0_73 = arith.constant 0 : index
      %c0_74 = arith.constant 0 : index
      %183 = vector.load %arg22[%c0_73, %c0_74] : memref<1x32xf32, #tpu.memory_space<vmem>>, vector<1x32xf32>
      %184 = arith.addf %182, %183 : vector<1x32xf32>
      %cst_75 = arith.constant 5.000000e-01 : f32
      %185 = vector.broadcast %cst_75 : f32 to vector<1x32xf32>
      %186 = arith.mulf %185, %184 : vector<1x32xf32>
      %cst_76 = arith.constant 0.707106769 : f32
      %187 = vector.broadcast %cst_76 : f32 to vector<1x32xf32>
      %188 = arith.mulf %184, %187 : vector<1x32xf32>
      %cst_77 = arith.constant 0.000000e+00 : f32
      %189 = vector.broadcast %cst_77 : f32 to vector<1x32xf32>
      %190 = arith.cmpf oge, %188, %189 : vector<1x32xf32>
      %cst_78 = arith.constant 1.000000e+00 : f32
      %cst_79 = arith.constant -1.000000e+00 : f32
      %191 = vector.broadcast %cst_78 : f32 to vector<1x32xf32>
      %192 = vector.broadcast %cst_79 : f32 to vector<1x32xf32>
      %193 = arith.select %190, %191, %192 : vector<1x32xi1>, vector<1x32xf32>
      %194 = math.absf %188 : vector<1x32xf32>
      %cst_80 = arith.constant 0.327591091 : f32
      %195 = vector.broadcast %cst_80 : f32 to vector<1x32xf32>
      %196 = arith.mulf %195, %194 : vector<1x32xf32>
      %cst_81 = arith.constant 1.000000e+00 : f32
      %197 = vector.broadcast %cst_81 : f32 to vector<1x32xf32>
      %198 = arith.addf %197, %196 : vector<1x32xf32>
      %cst_82 = arith.constant 1.000000e+00 : f32
      %199 = vector.broadcast %cst_82 : f32 to vector<1x32xf32>
      %200 = arith.divf %199, %198 : vector<1x32xf32>
      %cst_83 = arith.constant 1.06140542 : f32
      %201 = vector.broadcast %cst_83 : f32 to vector<1x32xf32>
      %202 = arith.mulf %201, %200 : vector<1x32xf32>
      %cst_84 = arith.constant -1.45315206 : f32
      %203 = vector.broadcast %cst_84 : f32 to vector<1x32xf32>
      %204 = arith.addf %202, %203 : vector<1x32xf32>
      %205 = arith.mulf %204, %200 : vector<1x32xf32>
      %cst_85 = arith.constant 1.42141378 : f32
      %206 = vector.broadcast %cst_85 : f32 to vector<1x32xf32>
      %207 = arith.addf %205, %206 : vector<1x32xf32>
      %208 = arith.mulf %207, %200 : vector<1x32xf32>
      %cst_86 = arith.constant -0.284496725 : f32
      %209 = vector.broadcast %cst_86 : f32 to vector<1x32xf32>
      %210 = arith.addf %208, %209 : vector<1x32xf32>
      %211 = arith.mulf %210, %200 : vector<1x32xf32>
      %cst_87 = arith.constant 0.254829586 : f32
      %212 = vector.broadcast %cst_87 : f32 to vector<1x32xf32>
      %213 = arith.addf %211, %212 : vector<1x32xf32>
      %214 = arith.mulf %213, %200 : vector<1x32xf32>
      %cst_88 = arith.constant 0.000000e+00 : f32
      %215 = vector.broadcast %cst_88 : f32 to vector<1x32xf32>
      %216 = arith.subf %215, %194 : vector<1x32xf32>
      %217 = arith.mulf %216, %194 : vector<1x32xf32>
      %218 = math.exp %217 : vector<1x32xf32>
      %219 = arith.mulf %214, %218 : vector<1x32xf32>
      %cst_89 = arith.constant 1.000000e+00 : f32
      %220 = vector.broadcast %cst_89 : f32 to vector<1x32xf32>
      %221 = arith.subf %220, %219 : vector<1x32xf32>
      %222 = arith.mulf %193, %221 : vector<1x32xf32>
      %cst_90 = arith.constant 1.000000e+00 : f32
      %223 = vector.broadcast %cst_90 : f32 to vector<1x32xf32>
      %224 = arith.addf %223, %222 : vector<1x32xf32>
      %225 = arith.mulf %186, %224 : vector<1x32xf32>
      %226 = arith.truncf %225 : vector<1x32xf32> to vector<1x32xbf16>
      %c0_91 = arith.constant 0 : index
      %c0_92 = arith.constant 0 : index
      %227 = vector.load %arg23[%c0_91, %c0_92] : memref<32x32xbf16, #tpu.memory_space<vmem>>, vector<32x32xbf16>
      %cst_93 = arith.constant dense<0.000000e+00> : vector<1x32xf32>
      %228 = tpu.matmul %226, %227, %cst_93 {dimension_numbers = #tpu.dot_dimension_numbers<[1], [0], [0], [1], [0, 0, 1, 1], [], []>} : vector<1x32xbf16>, vector<32x32xbf16>, vector<1x32xf32> -> vector<1x32xf32>
      %c0_94 = arith.constant 0 : index
      %c0_95 = arith.constant 0 : index
      %229 = vector.load %arg24[%c0_94, %c0_95] : memref<1x32xf32, #tpu.memory_space<vmem>>, vector<1x32xf32>
      %230 = arith.addf %228, %229 : vector<1x32xf32>
      %231 = vector.shape_cast %230 : vector<1x32xf32> to vector<1x1x32xf32>
      %c0_96 = arith.constant 0 : index
      %c0_97 = arith.constant 0 : index
      %c0_98 = arith.constant 0 : index
      %232 = vector.load %arg25[%c0_96, %c0_97, %c0_98] : memref<1x1x32xf32, #tpu.memory_space<vmem>>, vector<1x1x32xf32>
      tpu.vector_store %arg25[%c0_96, %c0_97, %c0_98], %231 {strides = array<i32>} : memref<1x1x32xf32, #tpu.memory_space<vmem>>, vector<1x1x32xf32>,
    } else {
    }
    return
  }
  func.func @transform_0(%arg0: i32, %arg1: i32) -> (i32, i32, i32) {
    %c0_i32 = arith.constant 0 : i32
    %c0_i32_0 = arith.constant 0 : i32
    %c0_i32_1 = arith.constant 0 : i32
    return %arg0, %c0_i32, %c0_i32_0 : i32, i32, i32
  }
  func.func @transform_1(%arg0: i32, %arg1: i32) -> (i32, i32) {
    %c0_i32 = arith.constant 0 : i32
    %c0_i32_0 = arith.constant 0 : i32
    %c0_i32_1 = arith.constant 0 : i32
    return %c0_i32, %c0_i32_0 : i32, i32
  }
  func.func @transform_2(%arg0: i32, %arg1: i32) -> (i32, i32) {
    %c0_i32 = arith.constant 0 : i32
    %c0_i32_0 = arith.constant 0 : i32
    %c0_i32_1 = arith.constant 0 : i32
    return %c0_i32, %c0_i32_0 : i32, i32
  }
  func.func @transform_3(%arg0: i32, %arg1: i32) -> (i32, i32) {
    %c0_i32 = arith.constant 0 : i32
    %c0_i32_0 = arith.constant 0 : i32
    %c0_i32_1 = arith.constant 0 : i32
    return %c0_i32, %c0_i32_0 : i32, i32
  }
  func.func @transform_4(%arg0: i32, %arg1: i32) -> (i32, i32) {
    %c0_i32 = arith.constant 0 : i32
    %c0_i32_0 = arith.constant 0 : i32
    %c0_i32_1 = arith.constant 0 : i32
    return %c0_i32, %c0_i32_0 : i32, i32
  }
  func.func @transform_5(%arg0: i32, %arg1: i32) -> (i32, i32, i32) {
    %c0_i32 = arith.constant 0 : i32
    %c0_i32_0 = arith.constant 0 : i32
    %c0_i32_1 = arith.constant 0 : i32
    return %arg1, %c0_i32, %c0_i32_0 : i32, i32, i32
  }
  func.func @transform_6(%arg0: i32, %arg1: i32) -> (i32, i32, i32) {
    %c0_i32 = arith.constant 0 : i32
    %c0_i32_0 = arith.constant 0 : i32
    %c0_i32_1 = arith.constant 0 : i32
    return %arg1, %c0_i32, %c0_i32_0 : i32, i32, i32
  }
  func.func @transform_7(%arg0: i32, %arg1: i32) -> (i32, i32, i32) {
    %c0_i32 = arith.constant 0 : i32
    %c0_i32_0 = arith.constant 0 : i32
    %c0_i32_1 = arith.constant 0 : i32
    return %arg1, %c0_i32, %c0_i32_0 : i32, i32, i32
  }
  func.func @transform_8(%arg0: i32, %arg1: i32) -> (i32, i32, i32) {
    %c0_i32 = arith.constant 0 : i32
    %c0_i32_0 = arith.constant 0 : i32
    %c0_i32_1 = arith.constant 0 : i32
    return %arg1, %c0_i32, %c0_i32_0 : i32, i32, i32
  }
  func.func @transform_9(%arg0: i32, %arg1: i32) -> (i32, i32, i32) {
    %c0_i32 = arith.constant 0 : i32
    %c0_i32_0 = arith.constant 0 : i32
    %c0_i32_1 = arith.constant 0 : i32
    return %arg1, %c0_i32, %c0_i32_0 : i32, i32, i32
  }
  func.func @transform_10(%arg0: i32, %arg1: i32) -> (i32, i32, i32) {
    %c0_i32 = arith.constant 0 : i32
    %c0_i32_0 = arith.constant 0 : i32
    %c0_i32_1 = arith.constant 0 : i32
    return %arg1, %c0_i32, %c0_i32_0 : i32, i32, i32
  }
  func.func @transform_11(%arg0: i32, %arg1: i32) -> (i32, i32, i32) {
    %c0_i32 = arith.constant 0 : i32
    %c0_i32_0 = arith.constant 0 : i32
    %c0_i32_1 = arith.constant 0 : i32
    return %arg1, %c0_i32, %c0_i32_0 : i32, i32, i32
  }
  func.func @transform_12(%arg0: i32, %arg1: i32) -> (i32, i32, i32) {
    %c0_i32 = arith.constant 0 : i32
    %c0_i32_0 = arith.constant 0 : i32
    %c0_i32_1 = arith.constant 0 : i32
    return %arg1, %c0_i32, %c0_i32_0 : i32, i32, i32
  }
  func.func @transform_13(%arg0: i32, %arg1: i32) -> (i32, i32, i32) {
    %c0_i32 = arith.constant 0 : i32
    %c0_i32_0 = arith.constant 0 : i32
    %c0_i32_1 = arith.constant 0 : i32
    return %arg1, %c0_i32, %c0_i32_0 : i32, i32, i32
  }
  func.func @transform_14(%arg0: i32, %arg1: i32) -> (i32, i32, i32) {
    %c0_i32 = arith.constant 0 : i32
    %c0_i32_0 = arith.constant 0 : i32
    %c0_i32_1 = arith.constant 0 : i32
    return %arg1, %c0_i32, %c0_i32_0 : i32, i32, i32
  }
  func.func @transform_15(%arg0: i32, %arg1: i32) -> (i32, i32, i32) {
    %c0_i32 = arith.constant 0 : i32
    %c0_i32_0 = arith.constant 0 : i32
    %c0_i32_1 = arith.constant 0 : i32
    return %arg1, %c0_i32, %c0_i32_0 : i32, i32, i32
  }
  func.func @transform_16(%arg0: i32, %arg1: i32) -> (i32, i32, i32) {
    %c0_i32 = arith.constant 0 : i32
    %c0_i32_0 = arith.constant 0 : i32
    %c0_i32_1 = arith.constant 0 : i32
    return %arg1, %c0_i32, %c0_i32_0 : i32, i32, i32
  }
  func.func @transform_17(%arg0: i32, %arg1: i32) -> (i32, i32) {
    %c0_i32 = arith.constant 0 : i32
    %c0_i32_0 = arith.constant 0 : i32
    %c0_i32_1 = arith.constant 0 : i32
    return %c0_i32, %c0_i32_0 : i32, i32
  }
  func.func @transform_18(%arg0: i32, %arg1: i32) -> (i32, i32) {
    %c0_i32 = arith.constant 0 : i32
    %c0_i32_0 = arith.constant 0 : i32
    %c0_i32_1 = arith.constant 0 : i32
    return %c0_i32, %c0_i32_0 : i32, i32
  }
  func.func @transform_19(%arg0: i32, %arg1: i32) -> (i32, i32) {
    %c0_i32 = arith.constant 0 : i32
    %c0_i32_0 = arith.constant 0 : i32
    %c0_i32_1 = arith.constant 0 : i32
    return %c0_i32, %c0_i32_0 : i32, i32
  }
  func.func @transform_20(%arg0: i32, %arg1: i32) -> (i32, i32) {
    %c0_i32 = arith.constant 0 : i32
    %c0_i32_0 = arith.constant 0 : i32
    %c0_i32_1 = arith.constant 0 : i32
    return %c0_i32, %c0_i32_0 : i32, i32
  }
  func.func @transform_21(%arg0: i32, %arg1: i32) -> (i32, i32) {
    %c0_i32 = arith.constant 0 : i32
    %c0_i32_0 = arith.constant 0 : i32
    %c0_i32_1 = arith.constant 0 : i32
    return %c0_i32, %c0_i32_0 : i32, i32
  }
  func.func @transform_22(%arg0: i32, %arg1: i32) -> (i32, i32) {
    %c0_i32 = arith.constant 0 : i32
    %c0_i32_0 = arith.constant 0 : i32
    %c0_i32_1 = arith.constant 0 : i32
    return %c0_i32, %c0_i32_0 : i32, i32
  }
  func.func @transform_23(%arg0: i32, %arg1: i32) -> (i32, i32, i32) {
    %c0_i32 = arith.constant 0 : i32
    %c0_i32_0 = arith.constant 0 : i32
    %c0_i32_1 = arith.constant 0 : i32
    return %arg0, %c0_i32, %c0_i32_0 : i32, i32, i32
  }
}

</mosaic_0001>

<bundles_post_ra>
// kernel: _lambda_.1
= control target key start
LH: loop header
LB: loop body
LE: loop exit
PB: predicated region body
PF: predicated region fallthrough
CT: control target
= control target key end

     0   :  { %s5226_s0 = inlined_call_operand.vmem [shape: bf16[2,4,256], index: 0, kind: input, shape index: {}]   ;;  %s5227_s1 = inlined_call_operand.vmem [shape: bf16[256,128], index: 1, kind: input, shape index: {}]   ;;  %s5228_s2 = inlined_call_operand.vmem [shape: f32[1,128], index: 2, kind: input, shape index: {}]   ;;  %s5229_s3 = inlined_call_operand.vmem [shape: f32[1,128], index: 3, kind: input, shape index: {}]   ;;  %s5230_s4 = inlined_call_operand.vmem [shape: f32[5,128], index: 4, kind: input, shape index: {}]   ;;  %s5231_s5 = inlined_call_operand.vmem [shape: bf16[2,128,384], index: 5, kind: input, shape index: {}]   ;;  %s5232_s6 = inlined_call_operand.vmem [shape: f32[2,1,384], index: 6, kind: input, shape index: {}]   ;;  %s5233_s7 = inlined_call_operand.vmem [shape: bf16[2,128,128], index: 7, kind: input, shape index: {}]   ;;  %s5234_s8 = inlined_call_operand.vmem [shape: f32[2,1,128], index: 8, kind: input, shape index: {}]   ;;  %s5235_s9 = inlined_call_operand.vmem [shape: f32[2,1,128], index: 9, kind: input, shape index: {}]   ;;  %s5236_s10 = inlined_call_operand.vmem [shape: f32[2,1,128], index: 10, kind: input, shape index: {}]   ;;  %s5237_s11 = inlined_call_operand.vmem [shape: bf16[2,128,512], index: 11, kind: input, shape index: {}]   ;;  %s5238_s12 = inlined_call_operand.vmem [shape: f32[2,1,512], index: 12, kind: input, shape index: {}]   ;;  %s5239_s13 = inlined_call_operand.vmem [shape: bf16[2,512,128], index: 13, kind: input, shape index: {}]   ;;  %s5240_s14 = inlined_call_operand.vmem [shape: f32[2,1,128], index: 14, kind: input, shape index: {}]   ;;  %s5241_s15 = inlined_call_operand.vmem [shape: f32[2,1,128], index: 15, kind: input, shape index: {}]   ;;  %s5242_s16 = inlined_call_operand.vmem [shape: f32[2,1,128], index: 16, kind: input, shape index: {}]   ;;  %s5243_s17 = inlined_call_operand.vmem [shape: f32[1,128], index: 17, kind: input, shape index: {}]   ;;  %s5244_s18 = inlined_call_operand.vmem [shape: f32[1,128], index: 18, kind: input, shape index: {}]   ;;  %s5245_s19 = inlined_call_operand.vmem [shape: bf16[128,32], index: 19, kind: input, shape index: {}]   ;;  %s5246_s20 = inlined_call_operand.vmem [shape: f32[1,32], index: 20, kind: input, shape index: {}]   ;;  %s5247_s21 = inlined_call_operand.vmem [shape: bf16[32,32], index: 21, kind: input, shape index: {}]   ;;  %s5248_s22 = inlined_call_operand.vmem [shape: f32[1,32], index: 22, kind: input, shape index: {}]   ;;  %s5249_s23 = inlined_call_operand.hbm [shape: f32[2,1,32], index: 23, kind: output, shape index: {}]  }
   0x1   :  { %5266 = sst [smem:[#allocation19_spill]] %s5226_s0 }
   0x2   :  { %5267 = sst [smem:[#allocation20_spill]] %s5227_s1 }
   0x3   :  { %5268 = sst [smem:[#allocation21_spill]] %s5228_s2 }
   0x4   :  { %5269 = sst [smem:[#allocation22_spill]] %s5229_s3 }
   0x5   :  { %5270 = sst [smem:[#allocation23_spill]] %s5230_s4 }
   0x6   :  { %5271 = sst [smem:[#allocation24_spill]] %s5231_s5 }
   0x7   :  { %5272 = sst [smem:[#allocation25_spill]] %s5232_s6 }
   0x8   :  { %5273 = sst [smem:[#allocation26_spill]] %s5233_s7 }
   0x9   :  { %5274 = sst [smem:[#allocation27_spill]] %s5237_s11 }
   0xa   :  { %5275 = sst [smem:[#allocation28_spill]] %s5238_s12 }
   0xb   :  { %5276 = sst [smem:[#allocation29_spill]] %s5243_s17 }
   0xc   :  { %5277 = sst [smem:[#allocation30_spill]] %s5244_s18 }
   0xd   :  { %5278 = sst [smem:[#allocation31_spill]] %s5245_s19 }
   0xe   :  { %5279 = sst [smem:[#allocation32_spill]] %s5246_s20 }
   0xf   :  { %5280 = sst [smem:[#allocation33_spill]] %s5247_s21 }
  0x10   :  { %5281 = sst [smem:[#allocation34_spill]] %s5248_s22 }
  0x11   :  { %5282 = sst [smem:[#allocation35_spill]] %s5249_s23 }
  0x12   :  { %28 = vsyncpa [#allocation4], 0 }
  0x13   :  { %30 = vsyncpa [#allocation4 + $0x1], 0  ;;  %s4565_s4 = smov 0   ;;  %s4567_s30 = smov 0  }
  0x14   :  { %s4569_s24 = smov 0   ;;  %s4571_s25 = smov 0  }
  0x15   :  { %s4573_s5 = smov 0   ;;  %s4575_s1 = smov 0  }
  0x16   :  { %s4577_s26 = smov 0   ;;  %s4579_s2 = smov 0  }
  0x17 LB: > { %5283 = sst [smem:[#allocation6_spill]] %s4400_s4  ;;  %s3595_s6 = sadd.s32 4294967295, %s4428_s2   ;;  %s4428_s2 = sphi %s4579_s2, %s36_s2   ;;  %s4424_s26 = sphi %s4577_s26, %s5335_s26   ;;  %s4420_s1 = sphi %s4575_s1, %s5334_s1   ;;  %s4416_s5 = sphi %s4573_s5, %s5333_s5   ;;  %s4412_s25 = sphi %s4571_s25, %s5332_s25   ;;  %s4408_s24 = sphi %s4569_s24, %s5331_s24   ;;  %s4404_s30 = sphi %s4567_s30, %s5337_s30   ;;  %s4400_s4 = sphi %s4565_s4, %s5336_s4  }
  0x18   : > { %5284 = sst [smem:[#allocation7_spill]] %s4408_s24  ;;  %s3596_s27 = sadd.s32 4294967294, %s4428_s2  }
  0x19   : > { %5285 = sst [smem:[#allocation8_spill]] %s4412_s25  ;;  %s45_s7 = sadd.s32 1, %s4420_s1 }
  0x1a   : > { %5286 = sst [smem:[#allocation9_spill]] %s4416_s5  ;;  %p46_p0 = scmp.ge.s32.totalorder %s45_s7, 2 }
  0x1b   : > { %5287 = sst [smem:[#allocation10_spill]] %s4420_s1  ;;  %s48_s28 = sadd.s32 1, %s4424_s26 }
  0x1c   : > { %5288 = sst [smem:[#allocation11_spill]] %s4424_s26  ;;  %p613_p1 = scmp.ne.s32.totalorder %s4408_s24, %s4404_s30 }
  0x1d   : > { %5289 = sst [smem:[#allocation12_spill]] %s4428_s2  ;;  %p614_p2 = scmp.eq.s32.totalorder %s3595_s6, 3 }
  0x1e   : > { %s5339_s7 = smov (%p46_p0, %s45_s7), 0  ;;  %s5341_s28 = smov (!%p46_p0, %s48_s28), %s4424_s26 }
  0x1f   : > { %5290 = sst [smem:[#allocation13_spill]] %s5339_s7  ;;  %p4614_p3 = por %p614_p2, %p613_p1 }
  0x20   : > { %p619_p4 = scmp.ne.s32.totalorder %s4404_s30, %s4400_s4  ;;  %p50_p5 = scmp.ge.s32.totalorder %s5341_s28, 2 }
  0x21   : > { %s5291_s29 = scalar_select %p4614_p3, 1, 0 }
  0x22   : > { %p620_p6 = scmp.eq.s32.totalorder %s3596_s27, 3  ;;  %p3599_p7 = scmp.ge.s32.totalorder %s4428_s2, 1 }
  0x23   : > { %5292 = sst [smem:[#allocation14_spill]] %s5291_s29  ;;  %p758_p8 = scmp.lt.s32.totalorder %s4428_s2, 5 }
  0x24   : > { %s5343_s28 = smov (%p50_p5, %s5341_s28), 0  ;;  %p4624_p9 = por %p620_p6, %p619_p4 }
  0x25   : > { %5293 = sst [smem:[#allocation15_spill]] %s5343_s28  ;;  %p759_p10 = pnand %p3599_p7, %p758_p8 }
  0x26   : > { %s5294_s3 = scalar_select %p4624_p9, 1, 0 }
  0x27   : > { %s600_s0 = ssub.s32 %s4424_s26, %s5343_s28  ;;  %s603_s6 = sadd.s32 1, %s4408_s24 }
  0x28   : > { %5295 = sst [smem:[#allocation16_spill]] %s5294_s3  ;;  %p601_p11 = scmp.eq.s32.totalorder %s600_s0, 0 }
  0x29   : > { %762 = sbr.rel (%p759_p10) target bundleno = 3699 (0xe73), region = 112 }
  0x2a   : > { %s4632_s7 = scalar_select %p601_p11, %s4408_s24, %s603_s6  }
  0x2c   : > { %5296 = sst [smem:[#allocation17_spill]] %s4632_s7 }
  0x30   : > { %p867_p12 = scmp.lt.s32.totalorder %s4416_s5, 1  ;;  %p872_p13 = scmp.lt.s32.totalorder %s4412_s25, 1 }
  0x31   : > { %s5297_s26 = sld [smem:[#allocation19_spill]]  ;;  %s5299_s29 = sld [smem:[#allocation24_spill]] }
  0x32   : > { %s868_s1 = scalar_select %p867_p12, %s4416_s5, 1 }
  0x33   : > { %s4639_s4 = scalar_select %p872_p13, %s4412_s25, 1 }
  0x34   : > { %s3762_s0 = sshll.u32 %s868_s1, 2  ;;  %s5300_s1 = sld [smem:[#allocation26_spill]] }
  0x35   : > { %s4058_s27 = smul.u32 192, %s4639_s4  ;;  %s3763_s3 = sshll.u32 %s4639_s4, 6 }
  0x36   : > { %s4059_s24 = smul.u32 3, %s4639_s4  ;;  %s3764_s20 = sshll.u32 %s4639_s4, 8 }
  0x37   : > { %s4644_s7 = scalar_lea.vmem %s5297_s26, %s3762_s0  ;;  %s4652_s5 = scalar_lea.vmem %s5299_s29, %s4058_s27 }
  0x38   : > { %5298 = sst [smem:[#allocation18_spill]] %s4644_s7  ;;  %s5301_s26 = sld [smem:[#allocation25_spill]] }
  0x39   : > { %s3607_s22 = sshll.u32 %s4639_s4, 2  ;;  %s5302_s11 = sld [smem:[#allocation27_spill]] }
  0x3a   : > { %s4657_s21 = scalar_lea.vmem %s5300_s1, %s3763_s3  ;;  %s5303_s12 = sld [smem:[#allocation28_spill]] }
  0x3b   : > { %s4691_s25 = scalar_lea.vmem %s5239_s13, %s3764_s20  ;;  %s911_s29 = scalar_lea.vmem %s5240_s14, %s4639_s4 }
  0x3c   : > { %s914_s3 = scalar_lea.vmem %s5241_s15, %s4639_s4  ;;  %s5305_s6 = sld [smem:[#allocation8_spill]] }
  0x3e   : > { %s4662_s0 = scalar_lea.vmem %s5301_s26, %s4059_s24  ;;  %s5304_s24 = sand.u32 1, %s4404_s30  }
  0x3f   : > { %s4681_s28 = scalar_lea.vmem %s5302_s11, %s3764_s20 }
  0x40   : > { %s4686_s17 = scalar_lea.vmem %s5303_s12, %s3607_s22  ;;  %s4707_s22 = scalar_lea.vmem [#allocation3], %s5304_s24 }
  0x42   : > { %p3610_p0 = scmp.ne.s32.totalorder %s5305_s6, 0 }
  0x43   : > { %s5306_s26 = sld [smem:[#allocation20_spill]] (!%p3610_p0)  ;;  %s5308_s24 = sld [smem:[#allocation18_spill]] (!%p3610_p0) }
  0x44   : > { %922 = sbr.rel (%p3610_p0) target bundleno = 326 (0x146), region = 116  ;;  %s5309_s18 = sld [smem:[#allocation23_spill]] (!%p3610_p0) }
  0x45   : > { %s5310_s2 = sld [smem:[#allocation22_spill]] (!%p3610_p0)  ;;  %s5311_s19 = sld [smem:[#allocation21_spill]] (!%p3610_p0) }
  0x49   : > { %s5307_s12 = smov (!%p3610_p0), %s5306_s26  ;;  %v4145_v0 = vld [vmem:[%s5306_s26 + $0x40] sm:$0xff] (!%p3610_p0)  }
  0x4a   : > { %v4146_v1 = vld [vmem:[%s5307_s12] sm:$0xff] (!%p3610_p0)   ;;  %3766 = vmatprep.subr.bf16.mxu0 (!%p3610_p0), %v4145_v0  ;;  %v4147_v2 = vld [vmem:[%s5307_s12 + $0x48] sm:$0xff] (!%p3610_p0)   ;;  %v4149_v4 = vld [vmem:[%s5307_s12 + $0x50] sm:$0xff] (!%p3610_p0)  }
  0x4b   : > { %3767 = vmatpush3.bf16.msra.mxu0 %v4146_v1  ;;  %v4148_v3 = vld [vmem:[%s5307_s12 + $0x8] sm:$0xff]   ;;  %v4150_v5 = vld [vmem:[%s5307_s12 + $0x10] sm:$0xff]   ;;  %v4151_v6 = vld [vmem:[%s5307_s12 + $0x58] sm:$0xff]  }
  0x4c   : > { %3768 = vmatprep.subr.bf16.mxu0 %v4147_v2  ;;  %v4152_v7 = vld [vmem:[%s5307_s12 + $0x18] sm:$0xff]   ;;  %v4153_v8 = vld [vmem:[%s5307_s12 + $0x60] sm:$0xff]   ;;  %v4155_v10 = vld [vmem:[%s5307_s12 + $0x68] sm:$0xff]  }
  0x4d   : > { %v4154_v9 = vld [vmem:[%s5307_s12 + $0x20] sm:$0xff]   ;;  %v4156_v13 = vld [vmem:[%s5307_s12 + $0x28] sm:$0xff]   ;;  %v4157_v14 = vld [vmem:[%s5307_s12 + $0x70] sm:$0xff]  }
  0x4e   : > { %v3612_v11 = vld.sshfl [vmem:[%s5308_s24] sm:$0x33 pattern:$0x76325410]  ;;  %v4158_v15 = vld [vmem:[%s5307_s12 + $0x30] sm:$0xff]   ;;  %v4159_v16 = vld [vmem:[%s5307_s12 + $0x78] sm:$0xff]  }
  0x4f   : > { %3769 = vmatpush3.bf16.msra.mxu0 %v4148_v3  ;;  %v971_v12 = vcombine.high %v3612_v11, %v3612_v11  ;;  %v4160_v17 = vld [vmem:[%s5307_s12 + $0x38] sm:$0xff]   ;;  %v1110_v18 = vld [vmem:[%s5309_s18] sm:$0x1f] }
  0x50   : > { %3770 = vmatprep.subr.bf16.mxu0 %v4149_v4  ;;  %v1111_v19 = vld [vmem:[%s5310_s2] sm:$0x1]  ;;  %v1115_v25 = vrot.slane %v1110_v18, 1 }
  0x51   : > { %1102 = vmatprep.mubr.bf16.mxu0 %v971_v12  ;;  %v1112_v20 = vadd.f32 %v1111_v19, %v1110_v18  ;;  %v3611_v22 = vld [vmem:[%s5311_s19] ss:$0 sm:$0xff] }
  0x53   : > { %3771 = vmatpush3.bf16.msra.mxu0 %v4150_v5  ;;  %1113 = vst [vmem:[#allocation2] sm:$0x1] %v1112_v20 }
  0x54   : > { %3772 = vmatprep.subr.bf16.mxu0 %v4151_v6 }
  0x57   : > { %3773 = vmatpush3.bf16.msra.mxu0 %v4152_v7 }
  0x58   : > { %3774 = vmatprep.subr.bf16.mxu0 %v4153_v8 }
  0x5b   : > { %3775 = vmatpush3.bf16.msra.mxu0 %v4154_v9 }
  0x5c   : > { %3776 = vmatprep.subr.bf16.mxu0 %v4155_v10 }
  0x5f   : > { %3777 = vmatpush3.bf16.msra.mxu0 %v4156_v13 }
  0x60   : > { %3778 = vmatprep.subr.bf16.mxu0 %v4157_v14 }
  0x63   : > { %3779 = vmatpush3.bf16.msra.mxu0 %v4158_v15 }
  0x64   : > { %3780 = vmatprep.subr.bf16.mxu0 %v4159_v16 }
  0x67   : > { %3781 = vmatpush3.bf16.msra.mxu0 %v4160_v17 }
  0x6a   : > { %1103 = vmatmul.mubr.bf16.vlgmr.msra.gmra.mrb[0].mxu0 %v3612_v11 }
 0x13d   : > { %v3782_v21 = vpop.f32.mrb[0].mxu0 }
 0x13e   : > { %v3783_v23 = vpop.f32.mrb[1].mxu0 }
 0x13f   : > { %v3784_v24 = vadd.f32 %v3783_v23, %v3782_v21  ;;  %v3785_v26 = vpop.f32.mrb[2].mxu0 }
 0x140   : > { %v3786_v27 = vpop.f32.mrb[3].mxu0 }
 0x141   : > { %v1105_v28 = vadd.f32 %v3784_v24, %v3611_v22 }
 0x143   : > { %v1117_v29 = vadd.f32 %v1115_v25, %v1105_v28 }
 0x145   : > { %1118 = vst [vmem:[#allocation2 + $0x1] sm:$0xf] %v1117_v29 }
 0x146 PF: > { %v4161_v30 = vld [vmem:[%s4652_s5 + $0x4] ss:$12 sps:$4 sm:$0xff]   ;;  %v4163_v31 = vld [vmem:[%s4652_s5] ss:$12 sps:$4 sm:$0xff]   ;;  %v4430_v32 = vmov 0   ;;  %v4431_v33 = vmov 0.0   ;;  %v1155_v58 = vlaneseq  ;;  %s5312_s26 = scalar_lea.vmem %s5234_s8, %s4639_s4  ;;  %s5313_s2 = scalar_lea.vmem %s5235_s9, %s4639_s4 }
 0x147   : > { %1330 = vmatprep.mubr.bf16.mxu0 %v4430_v32  ;;  %3894 = vmatprep.subr.bf16.mxu1 %v4431_v33  ;;  %v4164_v34 = vld [vmem:[%s4652_s5 + $0x1c] ss:$12 sps:$4 sm:$0xff]   ;;  %v4166_v35 = vld [vmem:[%s4652_s5 + $0x18] ss:$12 sps:$4 sm:$0xff]   ;;  %v4167_v36 = vld [vmem:[%s4652_s5 + $0x34] ss:$12 sps:$4 sm:$0xff]   ;;  %s5314_s19 = scalar_lea.vmem %s5236_s10, %s4639_s4 }
 0x148   : > { %1298 = vmatprep.subr.bf16.mxu0 %v4161_v30  ;;  %v4169_v37 = vld [vmem:[%s4652_s5 + $0x30] ss:$12 sps:$4 sm:$0xff]   ;;  %v4170_v38 = vld [vmem:[%s4652_s5 + $0x4c] ss:$12 sps:$4 sm:$0xff]   ;;  %v4172_v39 = vld [vmem:[%s4652_s5 + $0x48] ss:$12 sps:$4 sm:$0xff]  }
 0x149   : > { %1299 = vmatpush1.bf16.msra.mxu0 %v4163_v31  ;;  %v4185_v40 = vld [vmem:[%s4652_s5 + $0x8] ss:$12 sps:$4 sm:$0xff]   ;;  %v4173_v41 = vld [vmem:[%s4652_s5 + $0x64] ss:$12 sps:$4 sm:$0xff]   ;;  %v4186_v42 = vld [vmem:[%s4652_s5 + $0x20] ss:$12 sps:$4 sm:$0xff]  }
 0x14a   : > { %1300 = vmatprep.subr.bf16.mxu0 %v4164_v34  ;;  %3895 = vmatpush3.bf16.msra.mxu1 %v4185_v40  ;;  %v4175_v43 = vld [vmem:[%s4652_s5 + $0x60] ss:$12 sps:$4 sm:$0xff]   ;;  %v4176_v44 = vld [vmem:[%s4652_s5 + $0x7c] ss:$12 sps:$4 sm:$0xff]   ;;  %v4178_v45 = vld [vmem:[%s4652_s5 + $0x78] ss:$12 sps:$4 sm:$0xff]  }
 0x14b   : > { %3896 = vmatprep.subr.bf16.mxu1 %v4431_v33  ;;  %v4187_v46 = vld [vmem:[%s4652_s5 + $0x38] ss:$12 sps:$4 sm:$0xff]   ;;  %v4179_v47 = vld [vmem:[%s4652_s5 + $0x94] ss:$12 sps:$4 sm:$0xff]   ;;  %v4188_v48 = vld [vmem:[%s4652_s5 + $0x50] ss:$12 sps:$4 sm:$0xff]  }
 0x14c   : > { %v4181_v49 = vld [vmem:[%s4652_s5 + $0x90] ss:$12 sps:$4 sm:$0xff]   ;;  %v4182_v50 = vld [vmem:[%s4652_s5 + $0xac] ss:$12 sps:$4 sm:$0xff]   ;;  %v4189_v51 = vld [vmem:[%s4652_s5 + $0x68] ss:$12 sps:$4 sm:$0xff]  }
 0x14d   : > { %1301 = vmatpush1.bf16.msra.mxu0 %v4166_v35  ;;  %v4184_v52 = vld [vmem:[%s4652_s5 + $0xa8] ss:$12 sps:$4 sm:$0xff]   ;;  %v1119_v53 = vld [vmem:[#allocation2] sm:$0x1f]  ;;  %v4192_v57 = vld [vmem:[%s4652_s5 + $0xb0] ss:$12 sps:$4 sm:$0xff]  }
 0x14e   : > { %1302 = vmatprep.subr.bf16.mxu0 %v4167_v36  ;;  %3897 = vmatpush3.bf16.msra.mxu1 %v4186_v42  ;;  %v4190_v54 = vld [vmem:[%s4652_s5 + $0x80] ss:$12 sps:$4 sm:$0xff]   ;;  %v1120_v55 = vpack.c.bf16 %v1119_v53, %v1119_v53  ;;  %v4191_v56 = vld [vmem:[%s4652_s5 + $0x98] ss:$12 sps:$4 sm:$0xff]   ;;  %vm4432_vm0 = vmmov 0   ;;  %v4809_v59 = vshrl.u32 %v1155_v58, 7 }
 0x14f   : > { %3898 = vmatprep.subr.bf16.mxu1 %v4431_v33  ;;  %3910 = vmatprep.mubr.msk.bf16.mxu1 %vm4432_vm0, %v4431_v33  ;;  %v4813_v61 = vld [vmem:[%s4662_s0] sm:$0x7]  ;;  %vm1469_vm1 = vcmask 130048   ;;  %s4433_s5 = smov 96   ;;  %s4434_s0 = smov 112   ;;  %vm1939_vm2 = vcmask 1041408  }
 0x150   : > { %v1161_v60 = vsub.s32 1, %v4809_v59  ;;  %v1157_v62 = vsub.s32 0, %v4809_v59  ;;  %s4435_s24 = smov 64   ;;  %s4436_s11 = smov 80   ;;  %v1165_v25 = vsub.s32 2, %v4809_v59  ;;  %vm1940_vm3 = vcmask 1042432  }
 0x151   : > { %1303 = vmatpush1.bf16.msra.mxu0 %v4169_v37  ;;  %s4437_s1 = smov 48   ;;  %s4438_s6 = smov 32   ;;  %v4440_v42 = vmov 65535   ;;  %vm1838_vm4 = vcmask 36864   ;;  %vm1935_vm5 = vcmask 39936   ;;  %vm2337_vm6 = vcmask 261120  }
 0x152   : > { %1304 = vmatprep.subr.bf16.mxu0 %v4170_v38  ;;  %3899 = vmatpush3.bf16.msra.mxu1 %v4187_v46  ;;  %v1162_v63 = vrot.slane %v4813_v61, %v1161_v60  ;;  %v1158_v2 = vrot.slane %v4813_v61, %v1157_v62  ;;  %s4439_s20 = smov 16   ;;  %v1166_v30 = vrot.slane %v4813_v61, %v1165_v25  ;;  %vm2339_vm7 = vcmask 392192  }
 0x153   : > { %3900 = vmatprep.subr.bf16.mxu1 %v4431_v33  ;;  %vm2341_vm8 = vcmask 523264   ;;  %vm2343_vm9 = vcmask 654336   ;;  %vm2345_vm10 = vcmask 785408   ;;  %vm2347_vm11 = vcmask 916480  }
 0x154   : > { %vm2464_vm12 = vcmask 1044480  }
 0x155   : > { %1305 = vmatpush1.bf16.msra.mxu0 %v4172_v39 }
 0x156   : > { %1306 = vmatprep.subr.bf16.mxu0 %v4173_v41  ;;  %3901 = vmatpush3.bf16.msra.mxu1 %v4188_v48 }
 0x157   : > { %3902 = vmatprep.subr.bf16.mxu1 %v4431_v33 }
 0x159   : > { %1307 = vmatpush1.bf16.msra.mxu0 %v4175_v43  ;;  %v1941_v43 = vsel %vm1939_vm2, 4294967295, %v4440_v42 }
 0x15a   : > { %1308 = vmatprep.subr.bf16.mxu0 %v4176_v44  ;;  %3903 = vmatpush3.bf16.msra.mxu1 %v4189_v51  ;;  %v4868_v46 = vsel %vm1940_vm3, %v1941_v43, 0 }
 0x15b   : > { %3904 = vmatprep.subr.bf16.mxu1 %v4431_v33 }
 0x15d   : > { %1309 = vmatpush1.bf16.msra.mxu0 %v4178_v45 }
 0x15e   : > { %1310 = vmatprep.subr.bf16.mxu0 %v4179_v47  ;;  %3905 = vmatpush3.bf16.msra.mxu1 %v4190_v54 }
 0x15f   : > { %3906 = vmatprep.subr.bf16.mxu1 %v4431_v33 }
 0x161   : > { %1311 = vmatpush1.bf16.msra.mxu0 %v4181_v49 }
 0x162   : > { %1312 = vmatprep.subr.bf16.mxu0 %v4182_v50  ;;  %3907 = vmatpush3.bf16.msra.mxu1 %v4191_v56 }
 0x163   : > { %3908 = vmatprep.subr.bf16.mxu1 %v4431_v33 }
 0x165   : > { %1313 = vmatpush1.bf16.msra.mxu0 %v4184_v52 }
 0x166   : > { %3938 = vmatprep.subr.bf16.mxu0 %v4431_v33  ;;  %3909 = vmatpush3.bf16.msra.mxu1 %v4192_v57 }
 0x167   : > { %3914 = vmatprep.subr.bf16.mxu1 %v4431_v33 }
 0x168   : > { %1331 = vmatmul.mubr.bf16.vlgmr.msra.gmra.mrb[0].mxu0 %v1120_v55 }
 0x169   : > { %3940 = vmatprep.mubr.msk.bf16.mxu0 %vm4432_vm0, %v4431_v33  ;;  %3911 = vmatmul.mubr.bf16.vlgmr.msra.gmra.mrb[0].mxu1 %v1120_v55 }
 0x16a   : > { %3916 = vmatprep.mubr.msk.bf16.mxu1 %vm4432_vm0, %v4431_v33 }
 0x23b   : > { %v1332_v0 = vpop.f32.mrb[0].mxu0 }
 0x23c   : > { %v1334_v1 = vpop.f32.mrb[1].mxu0  ;;  %v1333_v7 = vadd.f32 %v1332_v0, %v1158_v2  ;;  %v1373_v10 = vpop.f32.mrb[0].mxu1 }
 0x23d   : > { %v1335_v3 = vadd.f32 %v1334_v1, %v1162_v63  ;;  %v1336_v4 = vpop.f32.mrb[2].mxu0  ;;  %v3912_v11 = vpop.f32.mrb[1].mxu1  ;;  %v4854_v39 = vadd.f32 %v1373_v10, %v1166_v30 }
 0x23e   : > { %v1337_v5 = vpop.f32.mrb[3].mxu0  ;;  %v1401_v9 = vpack.c.bf16 %v1333_v7, %v1333_v7  ;;  %v1376_v12 = vpop.f32.mrb[2].mxu1 }
 0x23f   : > { %1413 = vrot.lane.b32.xlu1 %v1335_v3, %s4433_s5  ;;  %1410 = vrot.lane.b32.xlu0 %v1335_v3, %s4434_s0  ;;  %v1431_v6 = vpack.c.bf16 %v1335_v3, %v1335_v3  ;;  %v3913_v13 = vpop.f32.mrb[3].mxu1  ;;  %v1461_v45 = vpack.c.bf16 %v4854_v39, %v4854_v39 }
 0x241   : > { %v1474_v8 = vsel %vm1469_vm1, %v1431_v6, 0  ;;  %v1944_v51 = vand.u32 %v4868_v46, %v1461_v45 }
 0x242   : > { %3915 = vmatpush3.bf16.xpose.msra.mxu1 %v1474_v8 }
 0x243   : > { %1383 = vrot.lane.b32.xlu1 %v1333_v7, %s4433_s5  ;;  %1380 = vrot.lane.b32.xlu0 %v1333_v7, %s4434_s0 }
 0x244   : > { %3920 = vmatprep.subr.bf16.mxu1 %v4431_v33 }
 0x247   : > { %1419 = vrot.lane.b32.xlu1 %v1335_v3, %s4435_s24  ;;  %1416 = vrot.lane.b32.xlu0 %v1335_v3, %s4436_s11 }
 0x249   : > { %3917 = vmatmul.mubr.msk.bf16.vlgmr.msra.gmra.mrb[4].mxu1 %vm1469_vm1, %v1401_v9 }
 0x24a   : > { %3922 = vmatprep.mubr.msk.bf16.mxu1 %vm4432_vm0, %v4431_v33 }
 0x24b   : > { %1422 = vrot.lane.b32.xlu1 %v1335_v3, %s4437_s1  ;;  %1386 = vrot.lane.b32.xlu0 %v1333_v7, %s4436_s11 }
 0x24f   : > { %1425 = vrot.lane.b32.xlu1 %v1335_v3, %s4438_s6  ;;  %1389 = vrot.lane.b32.xlu0 %v1333_v7, %s4435_s24 }
 0x253   : > { %1428 = vrot.lane.b32.xlu1 %v1335_v3, %s4439_s20  ;;  %1392 = vrot.lane.b32.xlu0 %v1333_v7, %s4437_s1 }
 0x257   : > { %1398 = vrot.lane.b32.xlu1 %v1333_v7, %s4439_s20  ;;  %1395 = vrot.lane.b32.xlu0 %v1333_v7, %s4438_s6 }
 0x2b1   : > { %v1414_v14 = vpop.permute.xlu1 %1413  ;;  %v1411_v15 = vpop.permute.xlu0 %1410 }
 0x2b2   : > { %v1432_v16 = vpack.c.bf16 %v1411_v15, %v1411_v15  ;;  %v1433_v20 = vpack.c.bf16 %v1414_v14, %v1414_v14 }
 0x2b4   : > { %v1520_v17 = vsel %vm1469_vm1, %v1432_v16, 0  ;;  %v1566_v26 = vsel %vm1469_vm1, %v1433_v20, 0 }
 0x2b5   : > { %v1384_v18 = vpop.permute.xlu1 %1383  ;;  %v1381_v19 = vpop.permute.xlu0 %1380  ;;  %3921 = vmatpush3.bf16.xpose.msra.mxu1 %v1520_v17 }
 0x2b6   : > { %3926 = vmatprep.subr.bf16.mxu1 %v4431_v33  ;;  %v1402_v23 = vpack.c.bf16 %v1381_v19, %v1381_v19  ;;  %v1403_v36 = vpack.c.bf16 %v1384_v18, %v1384_v18 }
 0x2b9   : > { %v1420_v21 = vpop.permute.xlu1 %1419  ;;  %v1417_v22 = vpop.permute.xlu0 %1416 }
 0x2ba   : > { %v1435_v24 = vpack.c.bf16 %v1420_v21, %v1420_v21  ;;  %v1434_v31 = vpack.c.bf16 %v1417_v22, %v1417_v22 }
 0x2bc   : > { %v1658_v27 = vsel %vm1469_vm1, %v1435_v24, 0  ;;  %3923 = vmatmul.mubr.msk.bf16.vlgmr.msra.gmra.mrb[8].mxu1 %vm1469_vm1, %v1402_v23  ;;  %v1612_v40 = vsel %vm1469_vm1, %v1434_v31, 0 }
 0x2bd   : > { %3939 = vmatpush3.bf16.xpose.msra.mxu0 %v1658_v27  ;;  %v1423_v28 = vpop.permute.xlu1 %1422  ;;  %v1387_v29 = vpop.permute.xlu0 %1386  ;;  %3927 = vmatpush3.bf16.xpose.msra.mxu1 %v1566_v26 }
 0x2be   : > { %3928 = vmatprep.mubr.msk.bf16.mxu1 %vm4432_vm0, %v4431_v33  ;;  %3932 = vmatprep.subr.bf16.mxu1 %v4431_v33  ;;  %v1436_v47 = vpack.c.bf16 %v1423_v28, %v1423_v28  ;;  %v1404_v49 = vpack.c.bf16 %v1387_v29, %v1387_v29 }
 0x2bf   : > { %3950 = vmatprep.subr.bf16.mxu0 %v4431_v33 }
 0x2c0   : > { %v1704_v52 = vsel %vm1469_vm1, %v1436_v47, 0 }
 0x2c1   : > { %v1426_v34 = vpop.permute.xlu1 %1425  ;;  %v1390_v35 = vpop.permute.xlu0 %1389 }
 0x2c2   : > { %v1437_v37 = vpack.c.bf16 %v1426_v34, %v1426_v34  ;;  %v1405_v38 = vpack.c.bf16 %v1390_v35, %v1390_v35 }
 0x2c4   : > { %v1750_v41 = vsel %vm1469_vm1, %v1437_v37, 0  ;;  %3929 = vmatmul.mubr.msk.bf16.vlgmr.msra.gmra.mrb[12].mxu1 %vm1469_vm1, %v1403_v36  ;;  %3941 = vmatmul.mubr.msk.bf16.vlgmr.msra.gmra.mrb[4].mxu0 %vm1469_vm1, %v1405_v38 }
 0x2c5   : > { %3951 = vmatpush3.bf16.xpose.msra.mxu0 %v1750_v41  ;;  %v1393_v44 = vpop.permute.xlu0 %1392  ;;  %3933 = vmatpush3.bf16.xpose.msra.mxu1 %v1612_v40  ;;  %v1429_v53 = vpop.permute.xlu1 %1428 }
 0x2c6   : > { %3934 = vmatprep.mubr.msk.bf16.mxu1 %vm4432_vm0, %v4431_v33  ;;  %3952 = vmatprep.mubr.msk.bf16.mxu0 %vm4432_vm0, %v4431_v33  ;;  %v1438_v54 = vpack.c.bf16 %v1429_v53, %v1429_v53  ;;  %v1406_v55 = vpack.c.bf16 %v1393_v44, %v1393_v44 }
 0x2c7   : > { %3944 = vmatprep.subr.bf16.mxu1 %v4431_v33  ;;  %3962 = vmatprep.subr.bf16.mxu0 %v4431_v33 }
 0x2c8   : > { %v1796_v56 = vsel %vm1469_vm1, %v1438_v54, 0 }
 0x2c9   : > { %v1396_v48 = vpop.permute.xlu0 %1395  ;;  %v1399_v57 = vpop.permute.xlu1 %1398 }
 0x2ca   : > { %v1407_v50 = vpack.c.bf16 %v1396_v48, %v1396_v48  ;;  %v1408_v58 = vpack.c.bf16 %v1399_v57, %v1399_v57 }
 0x2cc   : > { %3935 = vmatmul.mubr.msk.bf16.vlgmr.msra.gmra.mrb[16].mxu1 %vm1469_vm1, %v1404_v49  ;;  %3953 = vmatmul.mubr.msk.bf16.vlgmr.msra.gmra.mrb[8].mxu0 %vm1469_vm1, %v1407_v50 }
 0x2cd   : > { %3945 = vmatpush3.bf16.xpose.msra.mxu1 %v1704_v52  ;;  %3946 = vmatprep.mubr.msk.bf16.mxu1 %vm4432_vm0, %v4431_v33 }
 0x2ce   : > { %3956 = vmatprep.subr.bf16.mxu1 %v4431_v33  ;;  %3963 = vmatpush3.bf16.msra.mxu0 %v1944_v51 }
 0x2cf   : > { %3964 = vmatprep.mubr.msk.bf16.mxu0 %vm4432_vm0, %v4431_v33  ;;  %3974 = vmatprep.subr.bf16.mxu0 %v4431_v33 }
 0x2d4   : > { %3947 = vmatmul.mubr.msk.bf16.vlgmr.msra.gmra.mrb[20].mxu1 %vm1469_vm1, %v1406_v55 }
 0x2d5   : > { %3957 = vmatpush3.bf16.xpose.msra.mxu1 %v1796_v56  ;;  %3958 = vmatprep.mubr.msk.bf16.mxu1 %vm4432_vm0, %v4431_v33 }
 0x2d6   : > { %3968 = vmatprep.subr.bf16.mxu1 %v4431_v33 }
 0x2dc   : > { %3959 = vmatmul.mubr.msk.bf16.vlgmr.msra.gmra.mrb[24].mxu1 %vm1469_vm1, %v1408_v58 }
 0x2dd   : > { %3970 = vmatprep.mubr.msk.bf16.mxu1 %vm4432_vm0, %v4431_v33 }
 0x31c   : > { %v1510_v61 = vpop.f32.mrb[4].mxu1 }
 0x31d   : > { %v3918_v63 = vpop.f32.mrb[5].mxu1  ;;  %v1839_v0 = vsel %vm1838_vm4, %v1510_v61, -inf }
 0x31e   : > { %1840 = vmax.xlane.f32.xlu0 %v1839_v0  ;;  %v1513_v1 = vpop.f32.mrb[6].mxu1 }
 0x31f   : > { %v3919_v2 = vpop.f32.mrb[7].mxu1 }
 0x38f   : > { %v1556_v3 = vpop.f32.mrb[8].mxu1 }
 0x390   : > { %v3924_v4 = vpop.f32.mrb[9].mxu1  ;;  %v1842_v5 = vsel %vm1838_vm4, %v1556_v3, -inf }
 0x391   : > { %1843 = vmax.xlane.f32.xlu1 %v1842_v5  ;;  %v1559_v6 = vpop.f32.mrb[10].mxu1 }
 0x392   : > { %v3925_v7 = vpop.f32.mrb[11].mxu1 }
 0x397   : > { %v1602_v8 = vpop.f32.mrb[12].mxu1  ;;  %v1694_v9 = vpop.f32.mrb[4].mxu0 }
 0x398   : > { %v3930_v10 = vpop.f32.mrb[13].mxu1  ;;  %v3942_v11 = vpop.f32.mrb[5].mxu0  ;;  %v1851_v12 = vsel %vm1838_vm4, %v1694_v9, -inf  ;;  %v1845_v13 = vsel %vm1838_vm4, %v1602_v8, -inf }
 0x399   : > { %v1697_v14 = vpop.f32.mrb[6].mxu0  ;;  %1852 = vmax.xlane.f32.xlu1 %v1851_v12  ;;  %1846 = vmax.xlane.f32.xlu0 %v1845_v13  ;;  %v1605_v15 = vpop.f32.mrb[14].mxu1 }
 0x39a   : > { %v3931_v16 = vpop.f32.mrb[15].mxu1  ;;  %v3943_v17 = vpop.f32.mrb[7].mxu0 }
 0x39f   : > { %v1648_v18 = vpop.f32.mrb[16].mxu1  ;;  %v1786_v19 = vpop.f32.mrb[8].mxu0 }
 0x3a0   : > { %v3936_v20 = vpop.f32.mrb[17].mxu1  ;;  %v3954_v21 = vpop.f32.mrb[9].mxu0  ;;  %v1857_v22 = vsel %vm1838_vm4, %v1786_v19, -inf  ;;  %v1848_v23 = vsel %vm1838_vm4, %v1648_v18, -inf }
 0x3a1   : > { %v1789_v24 = vpop.f32.mrb[10].mxu0  ;;  %1858 = vmax.xlane.f32.xlu1 %v1857_v22  ;;  %1849 = vmax.xlane.f32.xlu0 %v1848_v23  ;;  %v1651_v26 = vpop.f32.mrb[18].mxu1 }
 0x3a2   : > { %v3937_v27 = vpop.f32.mrb[19].mxu1  ;;  %v3955_v28 = vpop.f32.mrb[11].mxu0 }
 0x3a7   : > { %v1740_v29 = vpop.f32.mrb[20].mxu1 }
 0x3a8   : > { %v3948_v30 = vpop.f32.mrb[21].mxu1  ;;  %v1854_v31 = vsel %vm1838_vm4, %v1740_v29, -inf }
 0x3a9   : > { %1855 = vmax.xlane.f32.xlu0 %v1854_v31  ;;  %v1743_v34 = vpop.f32.mrb[22].mxu1 }
 0x3aa   : > { %v3949_v35 = vpop.f32.mrb[23].mxu1 }
 0x3ab   : > { %v1841_v42 = vpop.xlane.xlu0 %1840 }
 0x3ac   : > { %v1863_v43 = vsub.f32 %v1510_v61, %v1841_v42 }
 0x3ae   : > { %v1871_v44 = vmul.f32 1.442695, %v1863_v43 }
 0x3af   : > { %v1832_v36 = vpop.f32.mrb[24].mxu1 }
 0x3b0   : > { %v3960_v37 = vpop.f32.mrb[25].mxu1  ;;  %v1860_v38 = vsel %vm1838_vm4, %v1832_v36, -inf  ;;  %4281 = vpow2.f32 %v1871_v44 }
 0x3b1   : > { %1861 = vmax.xlane.f32.xlu0 %v1860_v38  ;;  %v1835_v40 = vpop.f32.mrb[26].mxu1 }
 0x3b2   : > { %1440 = vrot.lane.b32.xlu1 %v4854_v39, %s4434_s0  ;;  %v3961_v41 = vpop.f32.mrb[27].mxu1 }
 0x3b6   : > { %1446 = vrot.lane.b32.xlu1 %v4854_v39, %s4436_s11 }
 0x3ba   : > { %1449 = vrot.lane.b32.xlu1 %v4854_v39, %s4435_s24  ;;  %v4904_v45 = vpop.eup %4281 }
 0x3bb   : > { %v1887_v47 = vsel %vm1838_vm4, %v4904_v45, 0.0 }
 0x3c7   : > { %1443 = vrot.lane.b32.xlu0 %v4854_v39, %s4433_s5 }
 0x3de   : > { %1888 = vadd.xlane.f32.xlu1 %v1887_v47 }
 0x41e   : > { %v1844_v48 = vpop.xlane.xlu1 %1843 }
 0x41f   : > { %v1864_v49 = vsub.f32 %v1556_v3, %v1844_v48 }
 0x421   : > { %v1873_v50 = vmul.f32 1.442695, %v1864_v49 }
 0x423   : > { %4283 = vpow2.f32 %v1873_v50 }
 0x426   : > { %v1853_v51 = vpop.xlane.xlu1 %1852  ;;  %v1847_v52 = vpop.xlane.xlu0 %1846 }
 0x427   : > { %v1867_v53 = vsub.f32 %v1694_v9, %v1853_v51  ;;  %v1865_v54 = vsub.f32 %v1602_v8, %v1847_v52 }
 0x429   : > { %v1879_v55 = vmul.f32 1.442695, %v1867_v53  ;;  %v1875_v56 = vmul.f32 1.442695, %v1865_v54 }
 0x42b   : > { %4285 = vpow2.f32 %v1879_v55 }
 0x42c   : > { %4287 = vpow2.f32 %v1875_v56 }
 0x42d   : > { %v4908_v57 = vpop.eup %4283 }
 0x42e   : > { %v1859_v58 = vpop.xlane.xlu1 %1858  ;;  %v1850_v61 = vpop.xlane.xlu0 %1849  ;;  %v1890_v63 = vsel %vm1838_vm4, %v4908_v57, 0.0 }
 0x42f   : > { %v1869_v0 = vsub.f32 %v1786_v19, %v1859_v58  ;;  %v1866_v1 = vsub.f32 %v1648_v18, %v1850_v61  ;;  %1891 = vadd.xlane.f32.xlu0 %v1890_v63 }
 0x431   : > { %v1883_v2 = vmul.f32 1.442695, %v1869_v0  ;;  %v1877_v3 = vmul.f32 1.442695, %v1866_v1 }
 0x432   : > { %v1441_v4 = vpop.permute.xlu1 %1440 }
 0x433   : > { %4289 = vpow2.f32 %v1883_v2  ;;  %v1462_v5 = vpack.c.bf16 %v1441_v4, %v1441_v4 }
 0x434   : > { %4291 = vpow2.f32 %v1877_v3 }
 0x435   : > { %v4912_v6 = vpop.eup %4285  ;;  %v1990_v7 = vand.u32 %v4868_v46, %v1462_v5 }
 0x436   : > { %v1856_v8 = vpop.xlane.xlu0 %1855  ;;  %v1899_v9 = vsel %vm1838_vm4, %v4912_v6, 0.0  ;;  %v4917_v10 = vpop.eup %4287 }
 0x437   : > { %v1868_v11 = vsub.f32 %v1740_v29, %v1856_v8  ;;  %1900 = vadd.xlane.f32.xlu1 %v1899_v9  ;;  %3969 = vmatpush3.bf16.msra.mxu1 %v1990_v7  ;;  %v1893_v13 = vsel %vm1838_vm4, %v4917_v10, 0.0  ;;  %v1447_v26 = vpop.permute.xlu1 %1446 }
 0x438   : > { %3980 = vmatprep.subr.bf16.mxu1 %v4431_v33  ;;  %v1464_v40 = vpack.c.bf16 %v1447_v26, %v1447_v26  ;;  %v4195_v26 = vld [vmem:[%s4657_s21 + $0x10] sm:$0xff]  }
 0x439   : > { %v1881_v12 = vmul.f32 1.442695, %v1868_v11 }
 0x43a   : > { %v2082_v44 = vand.u32 %v4868_v46, %v1464_v40 }
 0x43b   : > { %4293 = vpow2.f32 %v1881_v12  ;;  %1894 = vadd.xlane.f32.xlu1 %v1893_v13  ;;  %v1450_v27 = vpop.permute.xlu1 %1449 }
 0x43c   : > { %v1465_v50 = vpack.c.bf16 %v1450_v27, %v1450_v27 }
 0x43d   : > { %v4922_v14 = vpop.eup %4289 }
 0x43e   : > { %v1862_v15 = vpop.xlane.xlu0 %1861  ;;  %v1905_v16 = vsel %vm1838_vm4, %v4922_v14, 0.0  ;;  %v4926_v17 = vpop.eup %4291  ;;  %v2128_v55 = vand.u32 %v4868_v46, %v1465_v50 }
 0x43f   : > { %v1870_v18 = vsub.f32 %v1832_v36, %v1862_v15  ;;  %1906 = vadd.xlane.f32.xlu0 %v1905_v16  ;;  %v1896_v20 = vsel %vm1838_vm4, %v4926_v17, 0.0 }
 0x441   : > { %v1885_v19 = vmul.f32 1.442695, %v1870_v18 }
 0x442   : > { %v1444_v29 = vpop.permute.xlu0 %1443 }
 0x443   : > { %4295 = vpow2.f32 %v1885_v19  ;;  %1897 = vadd.xlane.f32.xlu0 %v1896_v20  ;;  %v1463_v31 = vpack.c.bf16 %v1444_v29, %v1444_v29  ;;  %v4196_v29 = vld [vmem:[%s4657_s21 + $0x18] sm:$0xff]  }
 0x445   : > { %v4930_v21 = vpop.eup %4293  ;;  %v2036_v36 = vand.u32 %v4868_v46, %v1463_v31 }
 0x446   : > { %v1902_v22 = vsel %vm1838_vm4, %v4930_v21, 0.0 }
 0x447   : > { %1903 = vadd.xlane.f32.xlu0 %v1902_v22  ;;  %v4194_v22 = vld [vmem:[%s4657_s21 + $0x8] sm:$0xff]  }
 0x44c   : > { %1452 = vrot.lane.b32.xlu1 %v4854_v39, %s4437_s1 }
 0x44d   : > { %v4936_v23 = vpop.eup %4295 }
 0x44e   : > { %v1908_v24 = vsel %vm1838_vm4, %v4936_v23, 0.0 }
 0x44f   : > { %1909 = vadd.xlane.f32.xlu0 %v1908_v24 }
 0x450   : > { %1455 = vrot.lane.b32.xlu1 %v4854_v39, %s4438_s6 }
 0x465   : > { %1458 = vrot.lane.b32.xlu0 %v4854_v39, %s4439_s20 }
 0x46b   : > { %v1889_v28 = vpop.xlane.xlu1 %1888 }
 0x46c   : > { %4297 = vrcp.f32 %v1889_v28 }
 0x476   : > { %v4298_v30 = vpop.eup %4297 }
 0x477   : > { %v1919_v34 = vmul.f32 %v4298_v30, %v4904_v45  ;;  %v4197_v30 = vld [vmem:[%s4657_s21 + $0x20] sm:$0xff]  }
 0x479   : > { %v1927_v35 = vpack.c.bf16 %v1919_v34, %v1919_v34 }
 0x47b   : > { %3965 = vmatmul.mubr.msk.bf16.vlgmr.msra.gmra.mrb[12].mxu0 %vm1935_vm5, %v1927_v35 }
 0x47c   : > { %3975 = vmatpush3.bf16.msra.mxu0 %v2036_v36  ;;  %3976 = vmatprep.mubr.msk.bf16.mxu0 %vm4432_vm0, %v4431_v33 }
 0x47d   : > { %3986 = vmatprep.subr.bf16.mxu0 %v4431_v33 }
 0x4bc   : > { %v1892_v39 = vpop.xlane.xlu0 %1891 }
 0x4bd   : > { %4299 = vrcp.f32 %v1892_v39  ;;  %v4198_v39 = vld [vmem:[%s4657_s21 + $0x28] sm:$0xff]  }
 0x4c4   : > { %v1901_v37 = vpop.xlane.xlu1 %1900 }
 0x4c7   : > { %v4300_v38 = vpop.eup %4299 }
 0x4c8   : > { %v1920_v41 = vmul.f32 %v4300_v38, %v4908_v57  ;;  %v1895_v42 = vpop.xlane.xlu1 %1894 }
 0x4c9   : > { %4301 = vrcp.f32 %v1895_v42 }
 0x4ca   : > { %v1928_v43 = vpack.c.bf16 %v1920_v41, %v1920_v41  ;;  %4303 = vrcp.f32 %v1901_v37  ;;  %v4199_v37 = vld [vmem:[%s4657_s21 + $0x30] sm:$0xff]  }
 0x4cc   : > { %3971 = vmatmul.mubr.msk.bf16.vlgmr.msra.gmra.mrb[28].mxu1 %vm1935_vm5, %v1928_v43  ;;  %v1907_v45 = vpop.xlane.xlu0 %1906  ;;  %v1453_v48 = vpop.permute.xlu1 %1452 }
 0x4cd   : > { %3981 = vmatpush3.bf16.msra.mxu1 %v2082_v44  ;;  %3982 = vmatprep.mubr.msk.bf16.mxu1 %vm4432_vm0, %v4431_v33  ;;  %v1466_v61 = vpack.c.bf16 %v1453_v48, %v1453_v48  ;;  %v4200_v48 = vld [vmem:[%s4657_s21 + $0x38] sm:$0xff]  }
 0x4ce   : > { %3992 = vmatprep.subr.bf16.mxu1 %v4431_v33 }
 0x4cf   : > { %v2174_v7 = vand.u32 %v4868_v46, %v1466_v61 }
 0x4d0   : > { %v1898_v47 = vpop.xlane.xlu0 %1897  ;;  %v1456_v56 = vpop.permute.xlu1 %1455 }
 0x4d1   : > { %4305 = vrcp.f32 %v1898_v47  ;;  %v1467_v63 = vpack.c.bf16 %v1456_v56, %v1456_v56 }
 0x4d2   : > { %4307 = vrcp.f32 %v1907_v45 }
 0x4d3   : > { %v4302_v49 = vpop.eup %4301  ;;  %v2220_v8 = vand.u32 %v4868_v46, %v1467_v63 }
 0x4d4   : > { %v1921_v51 = vmul.f32 %v4302_v49, %v4917_v10  ;;  %v1904_v52 = vpop.xlane.xlu0 %1903  ;;  %v4304_v54 = vpop.eup %4303 }
 0x4d5   : > { %4309 = vrcp.f32 %v1904_v52  ;;  %v1923_v57 = vmul.f32 %v4304_v54, %v4912_v6 }
 0x4d6   : > { %v1929_v53 = vpack.c.bf16 %v1921_v51, %v1921_v51 }
 0x4d7   : > { %v1931_v4 = vpack.c.bf16 %v1923_v57, %v1923_v57 }
 0x4d8   : > { %3977 = vmatmul.mubr.msk.bf16.vlgmr.msra.gmra.mrb[16].mxu0 %vm1935_vm5, %v1929_v53 }
 0x4d9   : > { %3987 = vmatpush3.bf16.msra.mxu0 %v2128_v55  ;;  %3988 = vmatprep.mubr.msk.bf16.mxu0 %vm4432_vm0, %v4431_v33 }
 0x4da   : > { %3998 = vmatprep.subr.bf16.mxu0 %v4431_v33 }
 0x4db   : > { %v4306_v58 = vpop.eup %4305 }
 0x4dc   : > { %v1922_v0 = vmul.f32 %v4306_v58, %v4926_v17  ;;  %v1910_v1 = vpop.xlane.xlu0 %1909  ;;  %v4308_v2 = vpop.eup %4307 }
 0x4dd   : > { %4311 = vrcp.f32 %v1910_v1  ;;  %v1925_v9 = vmul.f32 %v4308_v2, %v4922_v14 }
 0x4de   : > { %v1930_v3 = vpack.c.bf16 %v1922_v0, %v1922_v0 }
 0x4df   : > { %v4310_v5 = vpop.eup %4309  ;;  %v1933_v13 = vpack.c.bf16 %v1925_v9, %v1925_v9 }
 0x4e0   : > { %3983 = vmatmul.mubr.msk.bf16.vlgmr.msra.gmra.mrb[32].mxu1 %vm1935_vm5, %v1930_v3  ;;  %3989 = vmatmul.mubr.msk.bf16.vlgmr.msra.gmra.mrb[20].mxu0 %vm1935_vm5, %v1931_v4  ;;  %v1459_v6 = vpop.permute.xlu0 %1458  ;;  %v1924_v10 = vmul.f32 %v4310_v5, %v4930_v21  ;;  %v4193_v21 = vld [vmem:[%s4657_s21] sm:$0xff]  }
 0x4e1   : > { %3993 = vmatpush3.bf16.msra.mxu1 %v2174_v7  ;;  %3999 = vmatpush3.bf16.msra.mxu0 %v2220_v8  ;;  %v1468_v11 = vpack.c.bf16 %v1459_v6, %v1459_v6 }
 0x4e2   : > { %3994 = vmatprep.mubr.msk.bf16.mxu1 %vm4432_vm0, %v4431_v33  ;;  %4000 = vmatprep.mubr.msk.bf16.mxu0 %vm4432_vm0, %v4431_v33  ;;  %v1932_v12 = vpack.c.bf16 %v1924_v10, %v1924_v10 }
 0x4e3   : > { %4004 = vmatprep.subr.bf16.mxu1 %v4431_v33  ;;  %4010 = vmatprep.subr.bf16.mxu0 %v4431_v33  ;;  %v2266_v16 = vand.u32 %v4868_v46, %v1468_v11 }
 0x4e7   : > { %v4312_v15 = vpop.eup %4311 }
 0x4e8   : > { %3995 = vmatmul.mubr.msk.bf16.vlgmr.msra.gmra.mrb[36].mxu1 %vm1935_vm5, %v1932_v12  ;;  %4001 = vmatmul.mubr.msk.bf16.vlgmr.msra.gmra.mrb[24].mxu0 %vm1935_vm5, %v1933_v13  ;;  %v1926_v14 = vmul.f32 %v4312_v15, %v4936_v23  ;;  %v3669_v15 = vld [vmem:[%s5312_s26] ss:$0 sm:$0xff] }
 0x4e9   : > { %4005 = vmatpush3.bf16.msra.mxu1 %v2266_v16  ;;  %4006 = vmatprep.mubr.msk.bf16.mxu1 %vm4432_vm0, %v4431_v33 }
 0x4ea   : > { %4026 = vmatprep.mubr.msk.bf16.mxu0 %vm4432_vm0, %v4431_v33  ;;  %v1934_v17 = vpack.c.bf16 %v1926_v14, %v1926_v14  ;;  %4011 = vmatpush3.bf16.msra.mxu0 %v4193_v21  ;;  %v4201_v21 = vld [vmem:[%s4681_s28] ss:$16 sps:$4 sm:$0xff]  }
 0x4eb   : > { %4012 = vmatprep.subr.bf16.mxu0 %v4431_v33 }
 0x4ee   : > { %4013 = vmatpush3.bf16.msra.mxu0 %v4194_v22  ;;  %v4203_v22 = vld [vmem:[%s4681_s28 + $0x4] ss:$16 sps:$4 sm:$0xff]  }
 0x4ef   : > { %4014 = vmatprep.subr.bf16.mxu0 %v4431_v33  ;;  %2708 = vmatprep.subr.bf16.mxu1 %v4203_v22  ;;  %v4263_v22 = vld [vmem:[%s4691_s25 + $0x18] sm:$0xff]  }
 0x4f0   : > { %4007 = vmatmul.mubr.msk.bf16.vlgmr.msra.gmra.mrb[40].mxu1 %vm1935_vm5, %v1934_v17 }
 0x4f1   : > { %2740 = vmatprep.mubr.bf16.mxu1 %v4430_v32  ;;  %2709 = vmatpush1.bf16.msra.mxu1 %v4201_v21  ;;  %v4262_v21 = vld [vmem:[%s4691_s25 + $0xd8] sm:$0xff]  }
 0x4f2   : > { %4015 = vmatpush3.bf16.msra.mxu0 %v4195_v26  ;;  %v4209_v26 = vld [vmem:[%s4681_s28 + $0x24] ss:$16 sps:$4 sm:$0xff]  }
 0x4f3   : > { %4016 = vmatprep.subr.bf16.mxu0 %v4431_v33  ;;  %2710 = vmatprep.subr.bf16.mxu1 %v4209_v26  ;;  %v4266_v26 = vld [vmem:[%s4691_s25 + $0xe0] sm:$0xff]  }
 0x4f6   : > { %4017 = vmatpush3.bf16.msra.mxu0 %v4196_v29  ;;  %v4210_v29 = vld [vmem:[%s4681_s28 + $0x28] ss:$16 sps:$4 sm:$0xff]  }
 0x4f7   : > { %4018 = vmatprep.subr.bf16.mxu0 %v4431_v33 }
 0x4fa   : > { %4019 = vmatpush3.bf16.msra.mxu0 %v4197_v30  ;;  %v4215_v30 = vld [vmem:[%s4681_s28 + $0x44] ss:$16 sps:$4 sm:$0xff]  }
 0x4fb   : > { %4020 = vmatprep.subr.bf16.mxu0 %v4431_v33 }
 0x4fe   : > { %4021 = vmatpush3.bf16.msra.mxu0 %v4198_v39 }
 0x4ff   : > { %4022 = vmatprep.subr.bf16.mxu0 %v4431_v33 }
 0x502   : > { %4023 = vmatpush3.bf16.msra.mxu0 %v4199_v37 }
 0x503   : > { %4024 = vmatprep.subr.bf16.mxu0 %v4431_v33 }
 0x506   : > { %4025 = vmatpush3.bf16.msra.mxu0 %v4200_v48  ;;  %v4225_v48 = vld [vmem:[%s4681_s28 + $0x80] ss:$16 sps:$4 sm:$0xff]  }
 0x54e   : > { %v4986_v46 = vpop.f32.mrb[12].mxu0 }
 0x54f   : > { %v3966_v18 = vpop.f32.mrb[13].mxu0 }
 0x550   : > { %v1983_v19 = vpop.f32.mrb[14].mxu0 }
 0x551   : > { %v3967_v20 = vpop.f32.mrb[15].mxu0  ;;  %v4317_v19 = vld [vmem:[#allocation2] sm:$0x1f] }
 0x59f   : > { %v2026_v23 = vpop.f32.mrb[28].mxu1 }
 0x5a0   : > { %2309 = vrot.lane.b32.xlu1 %v2026_v23, %s4439_s20  ;;  %v3972_v24 = vpop.f32.mrb[29].mxu1  ;;  %v4204_v23 = vld [vmem:[%s4681_s28 + $0x8] ss:$16 sps:$4 sm:$0xff]  }
 0x5a1   : > { %v2029_v27 = vpop.f32.mrb[30].mxu1  ;;  %v4206_v24 = vld [vmem:[%s4681_s28 + $0xc] ss:$16 sps:$4 sm:$0xff]  }
 0x5a2   : > { %v3973_v28 = vpop.f32.mrb[31].mxu1  ;;  %v4212_v27 = vld [vmem:[%s4681_s28 + $0x2c] ss:$16 sps:$4 sm:$0xff]   ;;  %2749 = vmatprep.subr.bf16.mxu0 %v4206_v24  ;;  %v4265_v24 = vld [vmem:[%s4691_s25 + $0x60] sm:$0xff]  }
 0x5a3   : > { %v4207_v28 = vld [vmem:[%s4681_s28 + $0x20] ss:$16 sps:$4 sm:$0xff]  }
 0x5a4   : > { %2711 = vmatpush1.bf16.msra.mxu1 %v4207_v28  ;;  %v4268_v28 = vld [vmem:[%s4691_s25 + $0xa0] sm:$0xff]  }
 0x5a5   : > { %2712 = vmatprep.subr.bf16.mxu1 %v4215_v30  ;;  %v4270_v30 = vld [vmem:[%s4691_s25 + $0xe8] sm:$0xff]  }
 0x5ab   : > { %v2072_v31 = vpop.f32.mrb[16].mxu0 }
 0x5ac   : > { %2313 = vrot.lane.b32.xlu0 %v2072_v31, %s4438_s6  ;;  %v3978_v34 = vpop.f32.mrb[17].mxu0  ;;  %v4218_v31 = vld [vmem:[%s4681_s28 + $0x4c] ss:$16 sps:$4 sm:$0xff]  }
 0x5ad   : > { %v2075_v35 = vpop.f32.mrb[18].mxu0  ;;  %v4213_v34 = vld [vmem:[%s4681_s28 + $0x40] ss:$16 sps:$4 sm:$0xff]  }
 0x5ae   : > { %v3979_v36 = vpop.f32.mrb[19].mxu0  ;;  %v4216_v35 = vld [vmem:[%s4681_s28 + $0x48] ss:$16 sps:$4 sm:$0xff]   ;;  %2713 = vmatpush1.bf16.msra.mxu1 %v4213_v34 }
 0x5af   : > { %v4272_v34 = vld [vmem:[%s4691_s25 + $0xa8] sm:$0xff]  }
 0x5b3   : > { %v2118_v38 = vpop.f32.mrb[32].mxu1  ;;  %v2164_v40 = vpop.f32.mrb[20].mxu0 }
 0x5b4   : > { %2321 = vrot.lane.b32.xlu0 %v2164_v40, %s4435_s24  ;;  %v3990_v41 = vpop.f32.mrb[21].mxu0  ;;  %2317 = vrot.lane.b32.xlu1 %v2118_v38, %s4437_s1  ;;  %v3984_v42 = vpop.f32.mrb[33].mxu1  ;;  %s5316_s1 = sld [smem:[#allocation8_spill]] }
 0x5b5   : > { %v2121_v43 = vpop.f32.mrb[34].mxu1  ;;  %v2167_v44 = vpop.f32.mrb[22].mxu0  ;;  %v4221_v41 = vld [vmem:[%s4681_s28 + $0x64] ss:$16 sps:$4 sm:$0xff]   ;;  %v4224_v42 = vld [vmem:[%s4681_s28 + $0x6c] ss:$16 sps:$4 sm:$0xff]  }
 0x5b6   : > { %v3985_v45 = vpop.f32.mrb[35].mxu1  ;;  %v3991_v47 = vpop.f32.mrb[23].mxu0  ;;  %v4219_v43 = vld [vmem:[%s4681_s28 + $0x60] ss:$16 sps:$4 sm:$0xff]   ;;  %v4222_v44 = vld [vmem:[%s4681_s28 + $0x68] ss:$16 sps:$4 sm:$0xff]   ;;  %2714 = vmatprep.subr.bf16.mxu1 %v4221_v41 }
 0x5b7   : > { %2715 = vmatpush1.bf16.msra.mxu1 %v4219_v43  ;;  %v4227_v45 = vld [vmem:[%s4681_s28 + $0x84] ss:$16 sps:$4 sm:$0xff]   ;;  %v4230_v47 = vld [vmem:[%s4681_s28 + $0x8c] ss:$16 sps:$4 sm:$0xff]   ;;  %v2526_v43 = vld [vmem:[%s4686_s17] sm:$0xf] }
 0x5b8   : > { %2716 = vmatprep.subr.bf16.mxu1 %v4227_v45  ;;  %v4279_v41 = vld [vmem:[%s4691_s25 + $0x38] sm:$0xff]   ;;  %v2531_v45 = vrot.slane %v2526_v43, %v1157_v62 }
 0x5ba   : > { %p3747_p1 = scmp.ne.s32.totalorder %s5316_s1, 1 }
 0x5bb   : > { %v2210_v49 = vpop.f32.mrb[36].mxu1  ;;  %v2256_v50 = vpop.f32.mrb[24].mxu0  ;;  %2717 = vmatpush1.bf16.msra.mxu1 %v4225_v48  ;;  %v2535_v48 = vrot.slane %v2526_v43, %v1161_v60  ;;  %vm3178_vm13 = vcmask (!%p3747_p1), 1040384   ;;  %s5317_s21 = sld [smem:[#allocation31_spill]] (!%p3747_p1)  ;;  %vm4442_vm14 = vmmov (!%p3747_p1), 0   ;;  %s5319_s20 = sld [smem:[#allocation30_spill]] (!%p3747_p1) }
 0x5bc   : > { %2329 = vrot.lane.b32.xlu0 %v2256_v50, %s4433_s5  ;;  %v4002_v51 = vpop.f32.mrb[25].mxu0  ;;  %2325 = vrot.lane.b32.xlu1 %v2210_v49, %s4436_s11  ;;  %v3996_v52 = vpop.f32.mrb[37].mxu1  ;;  %v4228_v49 = vld [vmem:[%s4681_s28 + $0x88] ss:$16 sps:$4 sm:$0xff]   ;;  %v4233_v50 = vld [vmem:[%s4681_s28 + $0xa4] ss:$16 sps:$4 sm:$0xff]   ;;  %s5315_s11 = scalar_lea.vmem %s5242_s16, %s4639_s4 }
 0x5bd   : > { %v2213_v53 = vpop.f32.mrb[38].mxu1  ;;  %v2259_v54 = vpop.f32.mrb[26].mxu0  ;;  %v4236_v51 = vld [vmem:[%s4681_s28 + $0xac] ss:$16 sps:$4 sm:$0xff]   ;;  %v4231_v52 = vld [vmem:[%s4681_s28 + $0xa0] ss:$16 sps:$4 sm:$0xff]   ;;  %2718 = vmatprep.subr.bf16.mxu1 %v4233_v50 }
 0x5be   : > { %v3997_v55 = vpop.f32.mrb[39].mxu1  ;;  %v4003_v56 = vpop.f32.mrb[27].mxu0  ;;  %v4234_v53 = vld [vmem:[%s4681_s28 + $0xa8] ss:$16 sps:$4 sm:$0xff]   ;;  %v4239_v54 = vld [vmem:[%s4681_s28 + $0xc4] ss:$16 sps:$4 sm:$0xff]  }
 0x5bf   : > { %2719 = vmatpush1.bf16.msra.mxu1 %v4231_v52  ;;  %v4242_v55 = vld [vmem:[%s4681_s28 + $0xcc] ss:$16 sps:$4 sm:$0xff]   ;;  %v4237_v56 = vld [vmem:[%s4681_s28 + $0xc0] ss:$16 sps:$4 sm:$0xff]   ;;  %s5320_s18 = sld [smem:[#allocation33_spill]] (!%p3747_p1)  ;;  %s5321_s23 = sld [smem:[#allocation32_spill]] (!%p3747_p1) }
 0x5c0   : > { %2720 = vmatprep.subr.bf16.mxu1 %v4239_v54  ;;  %s5322_s17 = sld [smem:[#allocation34_spill]] (!%p3747_p1)  ;;  %vm3388_vm0 = vcmask (!%p3747_p1), 253952  }
 0x5c3   : > { %v2302_v57 = vpop.f32.mrb[40].mxu1  ;;  %2721 = vmatpush1.bf16.msra.mxu1 %v4237_v56 }
 0x5c4   : > { %2333 = vrot.lane.b32.xlu1 %v2302_v57, %s4434_s0  ;;  %v4008_v58 = vpop.f32.mrb[41].mxu1  ;;  %v4240_v57 = vld [vmem:[%s4681_s28 + $0xc8] ss:$16 sps:$4 sm:$0xff]  }
 0x5c5   : > { %v2305_v61 = vpop.f32.mrb[42].mxu1  ;;  %v4245_v58 = vld [vmem:[%s4681_s28 + $0xe4] ss:$16 sps:$4 sm:$0xff]  }
 0x5c6   : > { %v4009_v33 = vpop.f32.mrb[43].mxu1  ;;  %v4248_v61 = vld [vmem:[%s4681_s28 + $0xec] ss:$16 sps:$4 sm:$0xff]   ;;  %2722 = vmatprep.subr.bf16.mxu1 %v4245_v58 }
 0x5c7   : > { %v4243_v33 = vld [vmem:[%s4681_s28 + $0xe0] ss:$16 sps:$4 sm:$0xff]  }
 0x5c8   : > { %2723 = vmatpush1.bf16.msra.mxu1 %v4243_v33 }
 0x612   : > { %v2310_v63 = vpop.permute.xlu1 %2309 }
 0x613   : > { %v2336_v2 = vsel %vm1469_vm1, %v4986_v46, %v2310_v63  ;;  %v4246_v63 = vld [vmem:[%s4681_s28 + $0xe8] ss:$16 sps:$4 sm:$0xff]  }
 0x61e   : > { %v2314_v0 = vpop.permute.xlu0 %2313 }
 0x61f   : > { %v2338_v3 = vsel %vm2337_vm6, %v2336_v2, %v2314_v0  ;;  %v4249_v0 = vld [vmem:[%s4691_s25 + $0x40] sm:$0xff]  }
 0x620   : > { %3838 = vmatprep.subr.bf16.mxu1 %v4249_v0 }
 0x626   : > { %v2318_v1 = vpop.permute.xlu1 %2317  ;;  %v2322_v4 = vpop.permute.xlu0 %2321 }
 0x627   : > { %v2340_v5 = vsel %vm2339_vm7, %v2338_v3, %v2318_v1  ;;  %v4250_v1 = vld [vmem:[%s4691_s25 + $0xc0] sm:$0xff]  }
 0x628   : > { %v2342_v8 = vsel %vm2341_vm8, %v2340_v5, %v2322_v4 }
 0x62e   : > { %v2326_v7 = vpop.permute.xlu1 %2325  ;;  %v2330_v6 = vpop.permute.xlu0 %2329 }
 0x62f   : > { %v2344_v9 = vsel %vm2343_vm9, %v2342_v8, %v2326_v7  ;;  %v3678_v7 = vld [vmem:[%s5313_s2] ss:$0 sm:$0xff] }
 0x630   : > { %v2346_v10 = vsel %vm2345_vm10, %v2344_v9, %v2330_v6  ;;  %v3679_v6 = vld [vmem:[%s5314_s19] ss:$0 sm:$0xff] }
 0x636   : > { %v2334_v11 = vpop.permute.xlu1 %2333 }
 0x637   : > { %v2348_v12 = vsel %vm2347_vm11, %v2346_v10, %v2334_v11  ;;  %v4251_v11 = vld [vmem:[%s4691_s25] sm:$0xff]  }
 0x638   : > { %v2349_v13 = vpack.c.bf16 %v2348_v12, %v2348_v12  ;;  %v4252_v12 = vld [vmem:[%s4691_s25 + $0x80] sm:$0xff]  }
 0x63a   : > { %4027 = vmatmul.mubr.bf16.vlgmr.msra.gmra.mrb[28].mxu0 %v2349_v13 }
 0x63b   : > { %2781 = vmatprep.mubr.bf16.mxu0 %v4430_v32  ;;  %2750 = vmatpush1.bf16.msra.mxu0 %v4204_v23  ;;  %v4264_v23 = vld [vmem:[%s4691_s25 + $0x98] sm:$0xff]  }
 0x63c   : > { %2751 = vmatprep.subr.bf16.mxu0 %v4212_v27  ;;  %v4267_v27 = vld [vmem:[%s4691_s25 + $0x20] sm:$0xff]  }
 0x63f   : > { %2752 = vmatpush1.bf16.msra.mxu0 %v4210_v29  ;;  %v4269_v29 = vld [vmem:[%s4691_s25 + $0x68] sm:$0xff]  }
 0x640   : > { %2753 = vmatprep.subr.bf16.mxu0 %v4218_v31  ;;  %v4271_v31 = vld [vmem:[%s4691_s25 + $0x28] sm:$0xff]  }
 0x643   : > { %2754 = vmatpush1.bf16.msra.mxu0 %v4216_v35  ;;  %v4273_v35 = vld [vmem:[%s4691_s25 + $0x70] sm:$0xff]  }
 0x644   : > { %2755 = vmatprep.subr.bf16.mxu0 %v4224_v42  ;;  %v4280_v42 = vld [vmem:[%s4691_s25 + $0xb8] sm:$0xff]  }
 0x647   : > { %2756 = vmatpush1.bf16.msra.mxu0 %v4222_v44  ;;  %v2542_v44 = vsub.s32 3, %v4809_v59 }
 0x648   : > { %2757 = vmatprep.subr.bf16.mxu0 %v4230_v47  ;;  %v2539_v47 = vrot.slane %v2526_v43, %v1165_v25 }
 0x64b   : > { %2758 = vmatpush1.bf16.msra.mxu0 %v4228_v49  ;;  %v2543_v49 = vrot.slane %v2526_v43, %v2542_v44  ;;  %v4320_v43 = vld [vmem:[%s5317_s21 + $0x10] sm:$0xff] (!%p3747_p1)   ;;  %v4321_v44 = vld [vmem:[%s5317_s21 + $0x18] sm:$0xff] (!%p3747_p1)  }
 0x64c   : > { %2759 = vmatprep.subr.bf16.mxu0 %v4236_v51 }
 0x64f   : > { %2760 = vmatpush1.bf16.msra.mxu0 %v4234_v53 }
 0x650   : > { %2761 = vmatprep.subr.bf16.mxu0 %v4242_v55 }
 0x653   : > { %2762 = vmatpush1.bf16.msra.mxu0 %v4240_v57 }
 0x654   : > { %2763 = vmatprep.subr.bf16.mxu0 %v4248_v61 }
 0x657   : > { %2764 = vmatpush1.bf16.msra.mxu0 %v4246_v63 }
 0x658   : > { %3860 = vmatprep.subr.bf16.mxu0 %v4250_v1 }
 0x70d   : > { %v2455_v16 = vpop.f32.mrb[28].mxu0 }
 0x70e   : > { %v2456_v14 = vadd.f32 %v3669_v15, %v2455_v16  ;;  %v4028_v17 = vpop.f32.mrb[29].mxu0  ;;  %v4253_v15 = vld [vmem:[%s4691_s25 + $0x48] sm:$0xff]  }
 0x70f   : > { %v2458_v46 = vpop.f32.mrb[30].mxu0  ;;  %v4254_v16 = vld [vmem:[%s4691_s25 + $0xc8] sm:$0xff]  }
 0x710   : > { %v4029_v18 = vpop.f32.mrb[31].mxu0  ;;  %v2461_v20 = vadd.f32 %v4317_v19, %v2456_v14  ;;  %v4255_v14 = vld [vmem:[%s4691_s25 + $0x8] sm:$0xff]   ;;  %v4257_v46 = vld [vmem:[%s4691_s25 + $0x50] sm:$0xff]  }
 0x711   : > { %v4256_v17 = vld [vmem:[%s4691_s25 + $0x88] sm:$0xff]   ;;  %v4258_v18 = vld [vmem:[%s4691_s25 + $0xd0] sm:$0xff]  }
 0x712   : > { %v2465_v32 = vsel %vm2464_vm12, %v2461_v20, 0.0  ;;  %v4259_v19 = vld [vmem:[%s4691_s25 + $0x10] sm:$0xff]  }
 0x713   : > { %2466 = vadd.xlane.f32.xlu0 %v2465_v32  ;;  %v4261_v32 = vld [vmem:[%s4691_s25 + $0x58] sm:$0xff]  }
 0x7a0   : > { %v2467_v36 = vpop.xlane.xlu0 %2466 }
 0x7a1   : > { %v2469_v39 = vmul.f32 0.0078125, %v2467_v36  ;;  %v4274_v36 = vld [vmem:[%s4691_s25 + $0xf0] sm:$0xff]  }
 0x7a3   : > { %v2470_v37 = vsub.f32 %v2461_v20, %v2469_v39  ;;  %v4260_v20 = vld [vmem:[%s4691_s25 + $0x90] sm:$0xff]  }
 0x7a4   : > { %v4275_v39 = vld [vmem:[%s4691_s25 + $0x30] sm:$0xff]  }
 0x7a5   : > { %v2471_v38 = vmul.f32 %v2470_v37, %v2470_v37 }
 0x7a7   : > { %v2472_v40 = vsel %vm2464_vm12, %v2471_v38, 0.0  ;;  %v4277_v38 = vld [vmem:[%s4691_s25 + $0x78] sm:$0xff]  }
 0x7a8   : > { %2473 = vadd.xlane.f32.xlu1 %v2472_v40  ;;  %v4278_v40 = vld [vmem:[%s4691_s25 + $0xf8] sm:$0xff]  }
 0x835   : > { %v2474_v2 = vpop.xlane.xlu1 %2473 }
 0x836   : > { %v2475_v3 = vmul.f32 0.0078125, %v2474_v2 }
 0x838   : > { %v2476_v4 = vadd.f32 1e-05, %v2475_v3 }
 0x83a   : > { %4313 = vrsqrt.f32 %v2476_v4 }
 0x844   : > { %v4314_v5 = vpop.eup %4313 }
 0x845   : > { %v2478_v8 = vmul.f32 %v4314_v5, %v2470_v37  ;;  %v4276_v37 = vld [vmem:[%s4691_s25 + $0xb0] sm:$0xff]  }
 0x847   : > { %v2485_v9 = vmul.f32 %v3678_v7, %v2478_v8  ;;  %v3712_v7 = vld [vmem:[%s911_s29] ss:$0 sm:$0xff] }
 0x849   : > { %v5065_v10 = vadd.f32 %v3679_v6, %v2485_v9 }
 0x84b   : > { %v2493_v13 = vpack.c.bf16 %v5065_v10, %v5065_v10 }
 0x84d   : > { %2741 = vmatmul.mubr.bf16.vlgmr.msra.gmra.mrb[44].mxu1 %v2493_v13  ;;  %2782 = vmatmul.mubr.bf16.vlgmr.msra.gmra.mrb[32].mxu0 %v2493_v13 }
 0x84e   : > { %3839 = vmatpush3.bf16.msra.mxu1 %v4251_v11  ;;  %3861 = vmatpush3.bf16.msra.mxu0 %v4252_v12 }
 0x84f   : > { %3840 = vmatprep.subr.bf16.mxu1 %v4253_v15  ;;  %3862 = vmatprep.subr.bf16.mxu0 %v4254_v16 }
 0x852   : > { %3841 = vmatpush3.bf16.msra.mxu1 %v4255_v14  ;;  %3863 = vmatpush3.bf16.msra.mxu0 %v4256_v17 }
 0x853   : > { %3842 = vmatprep.subr.bf16.mxu1 %v4257_v46  ;;  %3864 = vmatprep.subr.bf16.mxu0 %v4258_v18 }
 0x856   : > { %3843 = vmatpush3.bf16.msra.mxu1 %v4259_v19  ;;  %3865 = vmatpush3.bf16.msra.mxu0 %v4260_v20 }
 0x857   : > { %3844 = vmatprep.subr.bf16.mxu1 %v4261_v32  ;;  %3866 = vmatprep.subr.bf16.mxu0 %v4262_v21 }
 0x85a   : > { %3845 = vmatpush3.bf16.msra.mxu1 %v4263_v22  ;;  %3867 = vmatpush3.bf16.msra.mxu0 %v4264_v23 }
 0x85b   : > { %3846 = vmatprep.subr.bf16.mxu1 %v4265_v24  ;;  %3868 = vmatprep.subr.bf16.mxu0 %v4266_v26 }
 0x85e   : > { %3847 = vmatpush3.bf16.msra.mxu1 %v4267_v27  ;;  %3869 = vmatpush3.bf16.msra.mxu0 %v4268_v28 }
 0x85f   : > { %3848 = vmatprep.subr.bf16.mxu1 %v4269_v29  ;;  %3870 = vmatprep.subr.bf16.mxu0 %v4270_v30  ;;  %v3746_v29 = vld [vmem:[%s5315_s11] ss:$0 sm:$0xff]  ;;  %s5318_s11 = sld [smem:[#allocation29_spill]] (!%p3747_p1) }
 0x862   : > { %3849 = vmatpush3.bf16.msra.mxu1 %v4271_v31  ;;  %3871 = vmatpush3.bf16.msra.mxu0 %v4272_v34 }
 0x863   : > { %3850 = vmatprep.subr.bf16.mxu1 %v4273_v35  ;;  %3872 = vmatprep.subr.bf16.mxu0 %v4274_v36  ;;  %v4318_v35 = vld [vmem:[%s5317_s21] sm:$0xff] (!%p3747_p1)   ;;  %v4441_v36 = vmov (!%p3747_p1), 0.0  }
 0x866   : > { %3851 = vmatpush3.bf16.msra.mxu1 %v4275_v39  ;;  %3873 = vmatpush3.bf16.msra.mxu0 %v4276_v37  ;;  %v4319_v39 = vld [vmem:[%s5317_s21 + $0x8] sm:$0xff] (!%p3747_p1)  }
 0x867   : > { %3852 = vmatprep.subr.bf16.mxu1 %v4277_v38  ;;  %3874 = vmatprep.subr.bf16.mxu0 %v4278_v40 }
 0x86a   : > { %3853 = vmatpush3.bf16.msra.mxu1 %v4279_v41  ;;  %3875 = vmatpush3.bf16.msra.mxu0 %v4280_v42 }
 0x86b   : > { %4030 = vmatprep.subr.bf16.mxu0 (!%p3747_p1), %v4441_v36  ;;  %4050 = vmatprep.subr.bf16.mxu1 (!%p3747_p1), %v4441_v36 }
 0x920   : > { %v2742_v50 = vpop.f32.mrb[44].mxu1  ;;  %v2783_v51 = vpop.f32.mrb[32].mxu0 }
 0x921   : > { %v2743_v52 = vadd.f32 %v2742_v50, %v2531_v45  ;;  %v2784_v53 = vadd.f32 %v2783_v51, %v2539_v47  ;;  %v2744_v54 = vpop.f32.mrb[45].mxu1  ;;  %v2785_v55 = vpop.f32.mrb[33].mxu0  ;;  %v4322_v45 = vld [vmem:[%s5317_s21 + $0x20] sm:$0xff] (!%p3747_p1)   ;;  %v4323_v47 = vld [vmem:[%s5317_s21 + $0x28] sm:$0xff] (!%p3747_p1)  }
 0x922   : > { %v2745_v56 = vadd.f32 %v2744_v54, %v2535_v48  ;;  %v2786_v57 = vadd.f32 %v2785_v55, %v2543_v49  ;;  %v2746_v58 = vpop.f32.mrb[46].mxu1  ;;  %v2787_v61 = vpop.f32.mrb[34].mxu0  ;;  %v4324_v48 = vld [vmem:[%s5317_s21 + $0x30] sm:$0xff] (!%p3747_p1)   ;;  %v4325_v49 = vld [vmem:[%s5317_s21 + $0x38] sm:$0xff] (!%p3747_p1)   ;;  %v3176_v54 = vld [vmem:[%s5318_s11] sm:$0x1] (!%p3747_p1) }
 0x923   : > { %v2790_v33 = vmax.f32 %v2743_v52, 0.0  ;;  %v2792_v62 = vmax.f32 %v2784_v53, 0.0  ;;  %v2747_v63 = vpop.f32.mrb[47].mxu1  ;;  %v2788_v0 = vpop.f32.mrb[35].mxu0 }
 0x924   : > { %v2791_v25 = vmax.f32 %v2745_v56, 0.0  ;;  %v2793_v1 = vmax.f32 %v2786_v57, 0.0  ;;  %v3177_v56 = vld [vmem:[%s5319_s20] sm:$0x1] (!%p3747_p1) }
 0x925   : > { %v2794_v2 = vpack.c.bf16 %v2790_v33, %v2790_v33  ;;  %v2796_v3 = vpack.c.bf16 %v2792_v62, %v2792_v62  ;;  %v4326_v33 = vld [vmem:[%s5320_s18] sm:$0xff] (!%p3747_p1)   ;;  %v4327_v62 = vld [vmem:[%s5320_s18 + $0x8] sm:$0xff] (!%p3747_p1)  }
 0x926   : > { %v2795_v59 = vpack.c.bf16 %v2791_v25, %v2791_v25  ;;  %v2797_v60 = vpack.c.bf16 %v2793_v1, %v2793_v1  ;;  %v3211_v63 = vld [vmem:[%s5321_s23] sm:$0x1] (!%p3747_p1) }
 0x928   : > { %3093 = vmatprep.mubr.bf16.mxu1 %v2795_v59  ;;  %3133 = vmatprep.mubr.bf16.mxu0 %v2797_v60 }
 0x929   : > { %3094 = vmatmul.mubr.bf16.vlgmr.msra.gmra.mrb[48].mxu1 %v2794_v2  ;;  %3134 = vmatmul.mubr.bf16.vlgmr.msra.gmra.mrb[36].mxu0 %v2796_v3 }
 0x92a   : > { %4031 = vmatpush3.bf16.msra.mxu0 (!%p3747_p1), %v4318_v35  ;;  %4046 = vmatprep.mubr.msk.bf16.mxu0 (!%p3747_p1), %vm4442_vm14, %v4441_v36 }
 0x92b   : > { %4032 = vmatprep.subr.bf16.mxu0 (!%p3747_p1), %v4441_v36  ;;  %4054 = vmatprep.mubr.msk.bf16.mxu1 (!%p3747_p1), %vm4442_vm14, %v4441_v36 }
 0x92c   : > { %4051 = vmatpush3.bf16.msra.mxu1 (!%p3747_p1), %v4326_v33 }
 0x92d   : > { %4052 = vmatprep.subr.bf16.mxu1 (!%p3747_p1), %v4441_v36 }
 0x92e   : > { %4033 = vmatpush3.bf16.msra.mxu0 (!%p3747_p1), %v4319_v39 }
 0x92f   : > { %4034 = vmatprep.subr.bf16.mxu0 (!%p3747_p1), %v4441_v36 }
 0x930   : > { %4053 = vmatpush3.bf16.msra.mxu1 (!%p3747_p1), %v4327_v62 }
 0x932   : > { %4035 = vmatpush3.bf16.msra.mxu0 (!%p3747_p1), %v4320_v43 }
 0x933   : > { %4036 = vmatprep.subr.bf16.mxu0 (!%p3747_p1), %v4441_v36 }
 0x936   : > { %4037 = vmatpush3.bf16.msra.mxu0 (!%p3747_p1), %v4321_v44 }
 0x937   : > { %4038 = vmatprep.subr.bf16.mxu0 (!%p3747_p1), %v4441_v36 }
 0x93a   : > { %4039 = vmatpush3.bf16.msra.mxu0 (!%p3747_p1), %v4322_v45 }
 0x93b   : > { %4040 = vmatprep.subr.bf16.mxu0 (!%p3747_p1), %v4441_v36 }
 0x93e   : > { %4041 = vmatpush3.bf16.msra.mxu0 (!%p3747_p1), %v4323_v47 }
 0x93f   : > { %4042 = vmatprep.subr.bf16.mxu0 (!%p3747_p1), %v4441_v36 }
 0x942   : > { %4043 = vmatpush3.bf16.msra.mxu0 (!%p3747_p1), %v4324_v48 }
 0x943   : > { %4044 = vmatprep.subr.bf16.mxu0 (!%p3747_p1), %v4441_v36 }
 0x946   : > { %4045 = vmatpush3.bf16.msra.mxu0 (!%p3747_p1), %v4325_v49 }
 0x9fc   : > { %v3854_v4 = vpop.f32.mrb[48].mxu1  ;;  %v3876_v5 = vpop.f32.mrb[36].mxu0 }
 0x9fd   : > { %v3855_v8 = vpop.f32.mrb[49].mxu1  ;;  %v3877_v6 = vpop.f32.mrb[37].mxu0 }
 0x9fe   : > { %v3856_v9 = vadd.f32 %v3855_v8, %v3854_v4  ;;  %v3878_v11 = vadd.f32 %v3877_v6, %v3876_v5  ;;  %v3857_v12 = vpop.f32.mrb[50].mxu1  ;;  %v3879_v13 = vpop.f32.mrb[38].mxu0 }
 0x9ff   : > { %v3858_v15 = vpop.f32.mrb[51].mxu1  ;;  %v3880_v16 = vpop.f32.mrb[39].mxu0 }
 0xa00   : > { %v3096_v14 = vadd.f32 %v3856_v9, %v3712_v7 }
 0xa02   : > { %v3136_v17 = vadd.f32 %v3878_v11, %v3096_v14 }
 0xa04   : > { %v3141_v46 = vadd.f32 %v3136_v17, %v5065_v10  ;;  %v3745_v10 = vld [vmem:[%s914_s3] ss:$0 sm:$0xff] }
 0xa06   : > { %v3144_v18 = vsel %vm2464_vm12, %v3141_v46, 0.0 }
 0xa07   : > { %3145 = vadd.xlane.f32.xlu0 %v3144_v18 }
 0xa94   : > { %v3146_v19 = vpop.xlane.xlu0 %3145 }
 0xa95   : > { %v3147_v20 = vmul.f32 0.0078125, %v3146_v19 }
 0xa97   : > { %v3148_v32 = vsub.f32 %v3141_v46, %v3147_v20 }
 0xa99   : > { %v3149_v21 = vmul.f32 %v3148_v32, %v3148_v32 }
 0xa9b   : > { %v3150_v22 = vsel %vm2464_vm12, %v3149_v21, 0.0  ;;  %v4443_v21 = vmov (!%p3747_p1), -1.0  }
 0xa9c   : > { %3151 = vadd.xlane.f32.xlu0 %v3150_v22 }
 0xb29   : > { %v3152_v23 = vpop.xlane.xlu0 %3151 }
 0xb2a   : > { %v3153_v24 = vmul.f32 0.0078125, %v3152_v23 }
 0xb2c   : > { %v3154_v26 = vadd.f32 1e-05, %v3153_v24 }
 0xb2e   : > { %4315 = vrsqrt.f32 %v3154_v26 }
 0xb38   : > { %v4316_v27 = vpop.eup %4315 }
 0xb39   : > { %v3156_v28 = vmul.f32 %v4316_v27, %v3148_v32  ;;  %3175 = sbr.rel (%p3747_p1) target bundleno = 3672 (0xe58), region = 120 }
 0xb3b   : > { %v3163_v30 = vmul.f32 %v3745_v10, %v3156_v28  ;;  %v3332_v28 = vld [vmem:[%s5322_s17] sm:$0x1] (!%p3747_p1) }
 0xb3d   : > { %v3170_v31 = vadd.f32 %v3746_v29, %v3163_v30 }
 0xb3f   : > { %3171 = vst [vmem:[#allocation2] sm:$0x1f] %v3170_v31  ;;  %v3179_v34 = vsel (!%p3747_p1), %vm3178_vm13, %v3170_v31, 0.0 }
 0xb40   : > { %3180 = vadd.xlane.f32.xlu0 %v3179_v34 }
 0xbcd   : > { %v3181_v37 = vpop.xlane.xlu0 %3180 }
 0xbce   : > { %v3182_v38 = vmul.f32 0.0078125, %v3181_v37 }
 0xbd0   : > { %v3183_v40 = vsub.f32 %v3170_v31, %v3182_v38 }
 0xbd2   : > { %v3184_v41 = vmul.f32 %v3183_v40, %v3183_v40 }
 0xbd4   : > { %v3185_v42 = vsel %vm3178_vm13, %v3184_v41, 0.0 }
 0xbd5   : > { %3186 = vadd.xlane.f32.xlu0 %v3185_v42 }
 0xc62   : > { %v3187_v50 = vpop.xlane.xlu0 %3186 }
 0xc63   : > { %v3188_v51 = vmul.f32 0.0078125, %v3187_v50 }
 0xc65   : > { %v3189_v52 = vadd.f32 1e-05, %v3188_v51 }
 0xc67   : > { %4328 = vrsqrt.f32 %v3189_v52 }
 0xc71   : > { %v4329_v53 = vpop.eup %4328 }
 0xc72   : > { %v3191_v55 = vmul.f32 %v4329_v53, %v3183_v40 }
 0xc74   : > { %v3192_v57 = vmul.f32 %v3191_v55, %v3176_v54 }
 0xc76   : > { %v3193_v58 = vadd.f32 %v3192_v57, %v3177_v56 }
 0xc78   : > { %v3194_v61 = vpack.c.bf16 %v3193_v58, %v3193_v58 }
 0xc7a   : > { %4047 = vmatmul.mubr.bf16.vlgmr.msra.gmra.mrb[0].mxu0 %v3194_v61 }
 0xd4d   : > { %v3294_v0 = vpop.f32.mrb[0].mxu0 }
 0xd4e   : > { %v3295_v25 = vadd.f32 %v3294_v0, %v3211_v63  ;;  %v4048_v1 = vpop.f32.mrb[1].mxu0 }
 0xd4f   : > { %v3297_v59 = vpop.f32.mrb[2].mxu0 }
 0xd50   : > { %v3301_v60 = vmul.f32 0.70710677, %v3295_v25  ;;  %v4049_v2 = vpop.f32.mrb[3].mxu0  ;;  %v3300_v24 = vmul.f32 0.5, %v3295_v25 }
 0xd52   : > { %v3304_v3 = vand.u32 2147483647, %v3301_v60  ;;  %vm3302_vm15 = vcmp.ge.f32.partialorder %v3301_v60, 0.0 }
 0xd53   : > { %v3303_v22 = vsel %vm3302_vm15, 1.0, %v4443_v21 }
 0xd54   : > { %v3305_v4 = vmul.f32 0.3275911, %v3304_v3  ;;  %v3318_v7 = vsub.f32 0.0, %v3304_v3 }
 0xd56   : > { %v3306_v5 = vadd.f32 1.0, %v3305_v4  ;;  %v3319_v6 = vmul.f32 %v3318_v7, %v3304_v3 }
 0xd58   : > { %4330 = vrcp.f32 %v3306_v5  ;;  %v3320_v12 = vmul.f32 1.442695, %v3319_v6 }
 0xd5a   : > { %4332 = vpow2.f32 %v3320_v12 }
 0xd62   : > { %v4331_v8 = vpop.eup %4330 }
 0xd63   : > { %v3309_v9 = vmul.f32 1.0614054, %v4331_v8 }
 0xd64   : > { %v4333_v19 = vpop.eup %4332 }
 0xd65   : > { %v3310_v11 = vadd.f32 -1.4531521, %v3309_v9 }
 0xd67   : > { %v3311_v13 = vmul.f32 %v4331_v8, %v3310_v11 }
 0xd69   : > { %v3312_v15 = vadd.f32 1.4214138, %v3311_v13 }
 0xd6b   : > { %v3313_v16 = vmul.f32 %v4331_v8, %v3312_v15 }
 0xd6d   : > { %v3314_v14 = vadd.f32 -0.28449672, %v3313_v16 }
 0xd6f   : > { %v3315_v17 = vmul.f32 %v4331_v8, %v3314_v14 }
 0xd71   : > { %v3316_v46 = vadd.f32 0.2548296, %v3315_v17 }
 0xd73   : > { %v3317_v18 = vmul.f32 %v4331_v8, %v3316_v46 }
 0xd75   : > { %v3322_v20 = vmul.f32 %v4333_v19, %v3317_v18 }
 0xd77   : > { %v3323_v32 = vsub.f32 1.0, %v3322_v20 }
 0xd79   : > { %v3324_v23 = vmul.f32 %v3323_v32, %v3303_v22 }
 0xd7b   : > { %v3325_v26 = vadd.f32 1.0, %v3324_v23 }
 0xd7d   : > { %v3326_v27 = vmul.f32 %v3325_v26, %v3300_v24 }
 0xd7f   : > { %v3327_v10 = vpack.c.bf16 %v3326_v27, %v3326_v27 }
 0xd81   : > { %4055 = vmatmul.mubr.msk.bf16.vlgmr.msra.gmra.mrb[0].mxu1 %vm2337_vm6, %v3327_v10 }
 0xe54   : > { %v3382_v29 = vpop.f32.mrb[0].mxu1 }
 0xe55   : > { %v3383_v30 = vadd.f32 %v3382_v29, %v3332_v28  ;;  %v4056_v31 = vpop.f32.mrb[1].mxu1 }
 0xe56   : > { %v3385_v34 = vpop.f32.mrb[2].mxu1 }
 0xe57   : > { %3389 = vst.msk [vmem:[%s4707_s22] sm:$0x1] %vm3388_vm0, %v3383_v30  ;;  %v4057_v35 = vpop.f32.mrb[3].mxu1 }
 0xe58 PF: > { %s5323_s25 = sld [smem:[#allocation9_spill]]  ;;  %s5325_s11 = sld [smem:[#allocation35_spill]] }
 0xe59   : > { %s3403_s6 = sshll.u32 %s4707_s22, 4  ;;  %s5326_s20 = sand.u32 1, %s4404_s30   ;;  %s3404_s6 = int_to_ptr.vmem [resolvable:$true] %s3403_s6 }
 0xe5a   : > { %s3391_s4 = scalar_lea.sflag [#allocation4], %s5326_s20  ;;  %s4334_s3 = scalar_lea.vmem %s3404_s6, 16 }
 0xe5b   : > { %p4335_p2 = scmp.ne.s32.totalorder %s3404_s6, %s4334_s3  ;;  %s4444_s26 = smov [#allocation3]  }
 0xe5c   : > { %s4338_s28 = sshll.u32 %s4444_s26, 4  ;;  %s4339_s28 = int_to_ptr.vmem [resolvable:$false] %s4338_s28 }
 0xe5d   : > { %p4336_p4 = pnand %p4335_p2, %p4614_p3  ;;  %s4340_s7 = scalar_lea.vmem %s4339_s28, 32 }
 0xe5e   : > { %s3759_s5 = sshll.u32 %s5323_s25, 4  ;;  %p4341_p6 = scmp.lt.s32.totalorder %s3404_s6, %s4339_s28 }
 0xe5f   : > { %s5176_s1 = scalar_lea.hbm %s5325_s11, %s3759_s5  ;;  %p4337_p5 = pneg %p4336_p4 }
 0xe60   : > { %p4342_p7 = scmp.lt.s32.totalorder %s4340_s7, %s4334_s3 }
 0xe62   : > { %p4343_p8 = por %p4342_p7, %p4341_p6 }
 0xe64   : > { %p4344_p10 = pnand %p4343_p8, %p4337_p5 }
 0xe66   : > { %4347 = shalt.err (!%p4344_p10)
}
 0xe67   : > { %s4348_s22 = scalar_lea.hbm %s5176_s1, 16  ;;  %s4352_s27 = scalar_lea.hbm %s5325_s11, 32 }
 0xe68   : > { %p4349_p11 = scmp.ne.s32.totalorder %s5176_s1, %s4348_s22  ;;  %p4353_p0 = scmp.lt.u32.totalorder %s5176_s1, %s5325_s11 }
 0xe69   : > { %p4354_p1 = scmp.lt.u32.totalorder %s4352_s27, %s4348_s22  ;;  %p4356_p4 = scmp.lt.u32.totalorder %s4348_s22, %s5176_s1 }
 0xe6a   : > { %p4350_p12 = pnand %p4349_p11, %p4614_p3 }
 0xe6b   : > { %p4355_p2 = por %p4354_p1, %p4353_p0 }
 0xe6c   : > { %p4351_p13 = pneg %p4350_p12 }
 0xe6d   : > { %p4357_p5 = por %p4356_p4, %p4355_p2 }
 0xe6f   : > { %p4358_p6 = pnand %p4357_p5, %p4351_p13 }
 0xe71   : > { %4361 = shalt.err (!%p4358_p6)
}
 0xe72   : > { %4060 = dma.vmem_to_hbm [thread:$0]  (%p4614_p3), %s3404_s6, 16, %s5176_s1, %s3391_s4  }
 0xe73 PF: > { %s5327_s25 = sld [smem:[#allocation12_spill]]  ;;  %s5328_s5 = sld [smem:[#allocation6_spill]] }
 0xe79   : > { %p4066_p7 = scmp.ge.s32.totalorder %s5327_s25, 2  ;;  %s3415_s24 = sand.u32 1, %s5328_s5  }
 0xe7a   : > { %s3416_s20 = scalar_lea.sflag [#allocation4], %s3415_s24 }
 0xe7b   : > { %p4063_p8 = pnand %p4066_p7, %p4624_p9 }
 0xe7d   : > { %4395 = dma.done.wait (!%p4063_p8), %s3416_s20, 16  }
 0xe7e   : > { %4397 = vsyncadd (!%p4063_p8), %s3416_s20, 4294967280  ;;  %s36_s2 = sadd.s32 1, %s5327_s25   ;;  %s5330_s3 = sld [smem:[#allocation7_spill]] }
 0xe7f   : > { %p33_p10 = scmp.ge.s32.totalorder %s36_s2, 6   ;;  %s5331_s24 = sld [smem:[#allocation17_spill]] }
 0xe80   : > { %s5332_s25 = sld [smem:[#allocation10_spill]]  ;;  %s5333_s5 = sld [smem:[#allocation11_spill]] }
 0xe81   : > { %s5334_s1 = sld [smem:[#allocation13_spill]]  ;;  %s5335_s26 = sld [smem:[#allocation15_spill]] }
 0xe82   : > { %s5336_s4 = smov %s4404_s30  ;;  %35 = sbr.rel (!%p33_p10) target bundleno = 23 (0x17), region = 191 }
 0xe84   : > { %s5337_s30 = smov %s5330_s3 }
 0xe89   :  { %3420 = vsyncpa [#allocation4], 1 }
 0xe8a   :  { %3422 = vsyncpa [#allocation4 + $0x1], 1 }

</bundles_post_ra>
